<compile_context>
chip_gen: v7x
topology: tpu7x:2x2x1
jax: 0.10.0
libtpu: 0.0.40
codegen_flags: <defaults>
</compile_context>

<pallas_src>
import functools
import math

import jax
import jax.numpy as jnp
from jax import lax
from jax.experimental import pallas as pl
from jax.experimental.pallas import tpu as pltpu


# ----------------------------- kernel bodies ---------------------------------

def _layernorm(x, gamma, beta, eps=1e-5):
    mu = jnp.mean(x, axis=-1, keepdims=True)
    var = jnp.mean((x - mu) ** 2, axis=-1, keepdims=True)
    return (x - mu) * lax.rsqrt(var + eps) * gamma + beta


def _block_body(x, B, T, heads,
                wq_ref, bq_ref, wk_ref, bk_ref, wu_ref, bu_ref,
                g1_ref, be1_ref, wf1_ref, bf1_ref, wf2_ref, bf2_ref,
                g2_ref, be2_ref):
    """One EncoderBlock on a flattened (M=B*T, K) activation. Returns f32 (M,K)."""
    M, K = x.shape
    dh = K // heads
    scale = 1.0 / math.sqrt(dh)

    xb = x.astype(jnp.bfloat16)
    q = jnp.dot(xb, wq_ref[...], preferred_element_type=jnp.float32) + bq_ref[...]
    k = jnp.dot(xb, wk_ref[...], preferred_element_type=jnp.float32) + bk_ref[...]
    # Matches the PyTorch forward exactly: values come from key_linear, so
    # v == k bit-for-bit.  No third projection matmul.

    q_s = q * scale  # fold the score scale into q once

    # Multi-head attention.  The unify linear is distributed over heads:
    #   unify(concat_h attn_h) == sum_h attn_h @ Wu[h*dh:(h+1)*dh, :]
    # so no concatenate / scratch assembly of the head outputs is needed.
    u_rows = []
    for b in range(B):                      # static loops: tiny (T, dh) tiles
        r0 = b * T
        qb = q_s[r0:r0 + T, :]
        kb = k[r0:r0 + T, :]
        u_b = jnp.zeros((T, K), jnp.float32)
        for h in range(heads):
            c0 = h * dh
            qh = qb[:, c0:c0 + dh]
            kh = kb[:, c0:c0 + dh]
            # q @ k^T without materializing a transpose.
            s = lax.dot_general(qh, kh, (((1,), (1,)), ((), ())),
                                preferred_element_type=jnp.float32)
            s = s - jnp.max(s, axis=-1, keepdims=True)
            p = jnp.exp(s)
            p = p * pl.reciprocal(jnp.sum(p, axis=-1, keepdims=True), approx=True)
            oh = jnp.dot(p, kh, preferred_element_type=jnp.float32)   # v == k
            u_b = u_b + jnp.dot(oh, wu_ref[c0:c0 + dh, :],
                                preferred_element_type=jnp.float32)
        u_rows.append(u_b)
    u = jnp.concatenate(u_rows, axis=0) + bu_ref[...]    # row-wise (sublane) stack

    # residual with the projected query (assumed TransformerBlock semantics)
    x1 = _layernorm(u + q, g1_ref[...], be1_ref[...])

    ff = jnp.dot(x1.astype(jnp.bfloat16), wf1_ref[...],
                 preferred_element_type=jnp.float32) + bf1_ref[...]
    ff = jnp.maximum(ff, 0.0)
    ff = jnp.dot(ff.astype(jnp.bfloat16), wf2_ref[...],
                 preferred_element_type=jnp.float32) + bf2_ref[...]

    return _layernorm(ff + x1, g2_ref[...], be2_ref[...])


def encoder_block_kernel(B, T, heads,
                         x_ref,
                         wq_ref, bq_ref, wk_ref, bk_ref, wu_ref, bu_ref,
                         g1_ref, be1_ref, wf1_ref, bf1_ref, wf2_ref, bf2_ref,
                         g2_ref, be2_ref,
                         o_ref):
    y = _block_body(x_ref[...], B, T, heads,
                    wq_ref, bq_ref, wk_ref, bk_ref, wu_ref, bu_ref,
                    g1_ref, be1_ref, wf1_ref, bf1_ref, wf2_ref, bf2_ref,
                    g2_ref, be2_ref)
    o_ref[...] = y.astype(o_ref.dtype)


def encoder_block_with_heads_kernel(B, T, heads,
                                    x_ref,
                                    wq_ref, bq_ref, wk_ref, bk_ref, wu_ref, bu_ref,
                                    g1_ref, be1_ref, wf1_ref, bf1_ref,
                                    wf2_ref, bf2_ref, g2_ref, be2_ref,
                                    wkv_ref, bkv_ref,
                                    kv_ref):
    # Last encoder block fused with the final key/val heads: one (K, 2K) matmul
    # into a single 2K-wide output (split back into key / vals in the wrapper).
    y = _block_body(x_ref[...], B, T, heads,
                    wq_ref, bq_ref, wk_ref, bk_ref, wu_ref, bu_ref,
                    g1_ref, be1_ref, wf1_ref, bf1_ref, wf2_ref, bf2_ref,
                    g2_ref, be2_ref)
    kv = jnp.dot(y.astype(jnp.bfloat16), wkv_ref[...],
                 preferred_element_type=jnp.float32) + bkv_ref[...]
    kv_ref[...] = kv.astype(kv_ref.dtype)


# ----------------------------- wrappers --------------------------------------

_COMPILER_PARAMS = pltpu.CompilerParams(vmem_limit_bytes=32 * 1024 * 1024)


def _block_weight_list(p):
    return [p["wq"], p["bq"], p["wk"], p["bk"], p["wu"], p["bu"],
            p["g1"], p["be1"], p["wf1"], p["bf1"], p["wf2"], p["bf2"],
            p["g2"], p["be2"]]


def run_encoder_block(x_flat, bp, *, B, T, heads):
    # Single invocation over the full (M, K) activation (no per-batch grid).
    # TODO(synk): at large B*T, tile M (on batch-aligned boundaries) with a
    # "parallel" grid axis so v7x's two TensorCores both get work.
    M, K = x_flat.shape
    return pl.pallas_call(
        functools.partial(encoder_block_kernel, B, T, heads),
        out_shape=jax.ShapeDtypeStruct((M, K), jnp.float32),
        compiler_params=_COMPILER_PARAMS,
    )(x_flat, *_block_weight_list(bp))


def run_encoder_block_with_heads(x_flat, bp, wkv, bkv, *, B, T, heads):
    M, K = x_flat.shape
    return pl.pallas_call(
        functools.partial(encoder_block_with_heads_kernel, B, T, heads),
        out_shape=jax.ShapeDtypeStruct((M, 2 * K), jnp.float32),
        compiler_params=_COMPILER_PARAMS,
    )(x_flat, *_block_weight_list(bp), wkv, bkv)


def encoder_forward(inputs, params, *, heads, seq_length):
    # Embedding lookups stay in plain JAX (gather glue).
    B, T = inputs.shape
    K = params["embed_meaning"].shape[1]
    meaning = jnp.take(params["embed_meaning"], inputs, axis=0)      # (B, T, K)
    pos = params["embed_pos"][:seq_length]                           # (T, K)
    x = (meaning + pos[None, :, :]).reshape(B * T, K)                # flatten B*T

    for bp in params["blocks"][:-1]:
        x = run_encoder_block(x, bp, B=B, T=T, heads=heads)

    kv = run_encoder_block_with_heads(x, params["blocks"][-1],
                                      params["wkv"], params["bkv"],
                                      B=B, T=T, heads=heads)         # (M, 2K)
    key = kv[:, :K].reshape(B, T, K)
    vals = kv[:, K:].reshape(B, T, K)
    return key, vals


# ----------------------------- params ----------------------------------------

def _linear_init(key, fan_in, fan_out, w_dtype=jnp.bfloat16):
    kw, kb = jax.random.split(key)
    bound = 1.0 / math.sqrt(fan_in)
    w = jax.random.uniform(kw, (fan_in, fan_out), jnp.float32, -bound, bound)
    b = jax.random.uniform(kb, (1, fan_out), jnp.float32, -bound, bound)
    return w.astype(w_dtype), b


def init_params(key, *, n, k, heads, vocab_size, seq_length, layers):
    assert layers >= 1
    keys = jax.random.split(key, 4 + layers)
    params = {
        "embed_meaning": jax.random.normal(keys[0], (vocab_size, k), jnp.float32),
        "embed_pos": jax.random.normal(keys[1], (seq_length, k), jnp.float32),
    }
    hidden = n * k
    blocks = []
    for li in range(layers):
        bkeys = jax.random.split(keys[2 + li], 6)
        wq, bq = _linear_init(bkeys[0], k, k, jnp.bfloat16)
        wk, bk = _linear_init(bkeys[1], k, k, jnp.bfloat16)
        # (value_linear exists in the PyTorch module but is unused in forward.)
        wu, bu = _linear_init(bkeys[2], k, k, jnp.float32)   # unify; sliced per head
        wf1, bf1 = _linear_init(bkeys[3], k, hidden, jnp.bfloat16)   # FFN in
        wf2, bf2 = _linear_init(bkeys[4], hidden, k, jnp.bfloat16)   # FFN out
        blocks.append(dict(
            wq=wq, bq=bq, wk=wk, bk=bk, wu=wu, bu=bu,
            g1=jnp.ones((1, k), jnp.float32), be1=jnp.zeros((1, k), jnp.float32),
            wf1=wf1, bf1=bf1, wf2=wf2, bf2=bf2,
            g2=jnp.ones((1, k), jnp.float32), be2=jnp.zeros((1, k), jnp.float32),
        ))
    params["blocks"] = blocks
    wkey, bkey = _linear_init(keys[2 + layers], k, k, jnp.bfloat16)
    wval, bval = _linear_init(keys[3 + layers], k, k, jnp.bfloat16)
    # Fuse the two output heads into one lane-denser (K, 2K) matmul.
    params["wkv"] = jnp.concatenate([wkey, wval], axis=1)
    params["bkv"] = jnp.concatenate([bkey, bval], axis=1)
    return params


# ----------------------------- main -------------------------------------------

if __name__ == "__main__":
    n, k, heads = 2, 32, 4
    vocab_size, seq_length, layers = 16, 8, 2
    batch = 2

    root = jax.random.PRNGKey(0)
    pkey, ikey = jax.random.split(root)
    params = init_params(pkey, n=n, k=k, heads=heads,
                         vocab_size=vocab_size, seq_length=seq_length,
                         layers=layers)
    inputs = jax.random.randint(ikey, (batch, seq_length), 0, vocab_size,
                                dtype=jnp.int32)

    fwd = jax.jit(functools.partial(encoder_forward, heads=heads,
                                    seq_length=seq_length))
    key_out, val_out = fwd(inputs, params)
    jax.block_until_ready((key_out, val_out))

    assert key_out.shape == (batch, seq_length, k)
    assert val_out.shape == (batch, seq_length, k)
    assert bool(jnp.all(jnp.isfinite(key_out))) and bool(jnp.all(jnp.isfinite(val_out)))
    print("KERNEL_OK")
</pallas_src>

<mosaic_0001>
module attributes {stable_mosaic.version = 11 : i64} {
  func.func @encoder_block_with_heads_kernel(%arg0: memref<16x32xf32, #tpu.memory_space<vmem>>, %arg1: memref<32x32xbf16, #tpu.memory_space<vmem>>, %arg2: memref<1x32xf32, #tpu.memory_space<vmem>>, %arg3: memref<32x32xbf16, #tpu.memory_space<vmem>>, %arg4: memref<1x32xf32, #tpu.memory_space<vmem>>, %arg5: memref<32x32xf32, #tpu.memory_space<vmem>>, %arg6: memref<1x32xf32, #tpu.memory_space<vmem>>, %arg7: memref<1x32xf32, #tpu.memory_space<vmem>>, %arg8: memref<1x32xf32, #tpu.memory_space<vmem>>, %arg9: memref<32x64xbf16, #tpu.memory_space<vmem>>, %arg10: memref<1x64xf32, #tpu.memory_space<vmem>>, %arg11: memref<64x32xbf16, #tpu.memory_space<vmem>>, %arg12: memref<1x32xf32, #tpu.memory_space<vmem>>, %arg13: memref<1x32xf32, #tpu.memory_space<vmem>>, %arg14: memref<1x32xf32, #tpu.memory_space<vmem>>, %arg15: memref<32x64xbf16, #tpu.memory_space<vmem>>, %arg16: memref<1x64xf32, #tpu.memory_space<vmem>>, %arg17: memref<16x64xf32, #tpu.memory_space<vmem>>) attributes {dimension_semantics = [], scalar_prefetch = 0 : i64, scratch_operands = 0 : i64, tpu.core_type = #tpu.core_type<tc>} {
    %c0 = arith.constant 0 : index
    %c0_0 = arith.constant 0 : index
    %0 = vector.load %arg0[%c0, %c0_0] : memref<16x32xf32, #tpu.memory_space<vmem>>, vector<16x32xf32>
    %1 = arith.truncf %0 : vector<16x32xf32> to vector<16x32xbf16>
    %c0_1 = arith.constant 0 : index
    %c0_2 = arith.constant 0 : index
    %2 = vector.load %arg1[%c0_1, %c0_2] : memref<32x32xbf16, #tpu.memory_space<vmem>>, vector<32x32xbf16>
    %cst = arith.constant dense<0.000000e+00> : vector<16x32xf32>
    %3 = tpu.matmul %1, %2, %cst {dimension_numbers = #tpu.dot_dimension_numbers<[1], [0], [0], [1], [0, 0, 1, 1], [], []>} : vector<16x32xbf16>, vector<32x32xbf16>, vector<16x32xf32> -> vector<16x32xf32>
    %c0_3 = arith.constant 0 : index
    %c0_4 = arith.constant 0 : index
    %4 = vector.load %arg2[%c0_3, %c0_4] : memref<1x32xf32, #tpu.memory_space<vmem>>, vector<1x32xf32>
    %5 = vector.broadcast %4 : vector<1x32xf32> to vector<16x32xf32>
    %6 = arith.addf %3, %5 : vector<16x32xf32>
    %c0_5 = arith.constant 0 : index
    %c0_6 = arith.constant 0 : index
    %7 = vector.load %arg3[%c0_5, %c0_6] : memref<32x32xbf16, #tpu.memory_space<vmem>>, vector<32x32xbf16>
    %cst_7 = arith.constant dense<0.000000e+00> : vector<16x32xf32>
    %8 = tpu.matmul %1, %7, %cst_7 {dimension_numbers = #tpu.dot_dimension_numbers<[1], [0], [0], [1], [0, 0, 1, 1], [], []>} : vector<16x32xbf16>, vector<32x32xbf16>, vector<16x32xf32> -> vector<16x32xf32>
    %c0_8 = arith.constant 0 : index
    %c0_9 = arith.constant 0 : index
    %9 = vector.load %arg4[%c0_8, %c0_9] : memref<1x32xf32, #tpu.memory_space<vmem>>, vector<1x32xf32>
    %10 = vector.broadcast %9 : vector<1x32xf32> to vector<16x32xf32>
    %11 = arith.addf %8, %10 : vector<16x32xf32>
    %cst_10 = arith.constant 0.353553385 : f32
    %12 = vector.broadcast %cst_10 : f32 to vector<16x32xf32>
    %13 = arith.mulf %6, %12 : vector<16x32xf32>
    %14 = vector.extract_strided_slice %13 {offsets = [0, 0], sizes = [8, 32], strides = [1, 1]} : vector<16x32xf32> to vector<8x32xf32>
    %15 = vector.extract_strided_slice %11 {offsets = [0, 0], sizes = [8, 32], strides = [1, 1]} : vector<16x32xf32> to vector<8x32xf32>
    %cst_11 = arith.constant 0.000000e+00 : f32
    %16 = vector.broadcast %cst_11 : f32 to vector<8x32xf32>
    %17 = vector.extract_strided_slice %14 {offsets = [0, 0], sizes = [8, 8], strides = [1, 1]} : vector<8x32xf32> to vector<8x8xf32>
    %18 = vector.extract_strided_slice %15 {offsets = [0, 0], sizes = [8, 8], strides = [1, 1]} : vector<8x32xf32> to vector<8x8xf32>
    %cst_12 = arith.constant dense<0.000000e+00> : vector<8x8xf32>
    %19 = tpu.matmul %17, %18, %cst_12 {dimension_numbers = #tpu.dot_dimension_numbers<[1], [1], [0], [0], [0, 0, 1, 0], [], []>} : vector<8x8xf32>, vector<8x8xf32>, vector<8x8xf32> -> vector<8x8xf32>
    %cst_13 = arith.constant dense<0xFF800000> : vector<8xf32>
    %20 = vector.multi_reduction <maximumf>, %19, %cst_13 [1] : vector<8x8xf32> to vector<8xf32>
    %21 = vector.shape_cast %20 : vector<8xf32> to vector<8x1xf32>
    %22 = vector.broadcast %21 : vector<8x1xf32> to vector<8x8xf32>
    %23 = arith.subf %19, %22 : vector<8x8xf32>
    %24 = math.exp %23 : vector<8x8xf32>
    %cst_14 = arith.constant dense<0.000000e+00> : vector<8xf32>
    %25 = vector.multi_reduction <add>, %24, %cst_14 [1] : vector<8x8xf32> to vector<8xf32>
    %26 = vector.shape_cast %25 : vector<8xf32> to vector<8x1xf32>
    %27 = tpu.reciprocal %26 {approx = true} : vector<8x1xf32> -> vector<8x1xf32>
    %28 = vector.broadcast %27 : vector<8x1xf32> to vector<8x8xf32>
    %29 = arith.mulf %24, %28 : vector<8x8xf32>
    %cst_15 = arith.constant dense<0.000000e+00> : vector<8x8xf32>
    %30 = tpu.matmul %29, %18, %cst_15 {dimension_numbers = #tpu.dot_dimension_numbers<[1], [0], [0], [1], [0, 0, 1, 1], [], []>} : vector<8x8xf32>, vector<8x8xf32>, vector<8x8xf32> -> vector<8x8xf32>
    %c0_16 = arith.constant 0 : index
    %c0_17 = arith.constant 0 : index
    %31 = vector.load %arg5[%c0_16, %c0_17] : memref<32x32xf32, #tpu.memory_space<vmem>>, vector<8x32xf32>
    %cst_18 = arith.constant dense<0.000000e+00> : vector<8x32xf32>
    %32 = tpu.matmul %30, %31, %cst_18 {dimension_numbers = #tpu.dot_dimension_numbers<[1], [0], [0], [1], [0, 0, 1, 1], [], []>} : vector<8x8xf32>, vector<8x32xf32>, vector<8x32xf32> -> vector<8x32xf32>
    %33 = arith.addf %16, %32 : vector<8x32xf32>
    %34 = vector.extract_strided_slice %14 {offsets = [0, 8], sizes = [8, 8], strides = [1, 1]} : vector<8x32xf32> to vector<8x8xf32>
    %35 = vector.extract_strided_slice %15 {offsets = [0, 8], sizes = [8, 8], strides = [1, 1]} : vector<8x32xf32> to vector<8x8xf32>
    %cst_19 = arith.constant dense<0.000000e+00> : vector<8x8xf32>
    %36 = tpu.matmul %34, %35, %cst_19 {dimension_numbers = #tpu.dot_dimension_numbers<[1], [1], [0], [0], [0, 0, 1, 0], [], []>} : vector<8x8xf32>, vector<8x8xf32>, vector<8x8xf32> -> vector<8x8xf32>
    %cst_20 = arith.constant dense<0xFF800000> : vector<8xf32>
    %37 = vector.multi_reduction <maximumf>, %36, %cst_20 [1] : vector<8x8xf32> to vector<8xf32>
    %38 = vector.shape_cast %37 : vector<8xf32> to vector<8x1xf32>
    %39 = vector.broadcast %38 : vector<8x1xf32> to vector<8x8xf32>
    %40 = arith.subf %36, %39 : vector<8x8xf32>
    %41 = math.exp %40 : vector<8x8xf32>
    %cst_21 = arith.constant dense<0.000000e+00> : vector<8xf32>
    %42 = vector.multi_reduction <add>, %41, %cst_21 [1] : vector<8x8xf32> to vector<8xf32>
    %43 = vector.shape_cast %42 : vector<8xf32> to vector<8x1xf32>
    %44 = tpu.reciprocal %43 {approx = true} : vector<8x1xf32> -> vector<8x1xf32>
    %45 = vector.broadcast %44 : vector<8x1xf32> to vector<8x8xf32>
    %46 = arith.mulf %41, %45 : vector<8x8xf32>
    %cst_22 = arith.constant dense<0.000000e+00> : vector<8x8xf32>
    %47 = tpu.matmul %46, %35, %cst_22 {dimension_numbers = #tpu.dot_dimension_numbers<[1], [0], [0], [1], [0, 0, 1, 1], [], []>} : vector<8x8xf32>, vector<8x8xf32>, vector<8x8xf32> -> vector<8x8xf32>
    %c8 = arith.constant 8 : index
    %c0_23 = arith.constant 0 : index
    %48 = vector.load %arg5[%c8, %c0_23] : memref<32x32xf32, #tpu.memory_space<vmem>>, vector<8x32xf32>
    %cst_24 = arith.constant dense<0.000000e+00> : vector<8x32xf32>
    %49 = tpu.matmul %47, %48, %cst_24 {dimension_numbers = #tpu.dot_dimension_numbers<[1], [0], [0], [1], [0, 0, 1, 1], [], []>} : vector<8x8xf32>, vector<8x32xf32>, vector<8x32xf32> -> vector<8x32xf32>
    %50 = arith.addf %33, %49 : vector<8x32xf32>
    %51 = vector.extract_strided_slice %14 {offsets = [0, 16], sizes = [8, 8], strides = [1, 1]} : vector<8x32xf32> to vector<8x8xf32>
    %52 = vector.extract_strided_slice %15 {offsets = [0, 16], sizes = [8, 8], strides = [1, 1]} : vector<8x32xf32> to vector<8x8xf32>
    %cst_25 = arith.constant dense<0.000000e+00> : vector<8x8xf32>
    %53 = tpu.matmul %51, %52, %cst_25 {dimension_numbers = #tpu.dot_dimension_numbers<[1], [1], [0], [0], [0, 0, 1, 0], [], []>} : vector<8x8xf32>, vector<8x8xf32>, vector<8x8xf32> -> vector<8x8xf32>
    %cst_26 = arith.constant dense<0xFF800000> : vector<8xf32>
    %54 = vector.multi_reduction <maximumf>, %53, %cst_26 [1] : vector<8x8xf32> to vector<8xf32>
    %55 = vector.shape_cast %54 : vector<8xf32> to vector<8x1xf32>
    %56 = vector.broadcast %55 : vector<8x1xf32> to vector<8x8xf32>
    %57 = arith.subf %53, %56 : vector<8x8xf32>
    %58 = math.exp %57 : vector<8x8xf32>
    %cst_27 = arith.constant dense<0.000000e+00> : vector<8xf32>
    %59 = vector.multi_reduction <add>, %58, %cst_27 [1] : vector<8x8xf32> to vector<8xf32>
    %60 = vector.shape_cast %59 : vector<8xf32> to vector<8x1xf32>
    %61 = tpu.reciprocal %60 {approx = true} : vector<8x1xf32> -> vector<8x1xf32>
    %62 = vector.broadcast %61 : vector<8x1xf32> to vector<8x8xf32>
    %63 = arith.mulf %58, %62 : vector<8x8xf32>
    %cst_28 = arith.constant dense<0.000000e+00> : vector<8x8xf32>
    %64 = tpu.matmul %63, %52, %cst_28 {dimension_numbers = #tpu.dot_dimension_numbers<[1], [0], [0], [1], [0, 0, 1, 1], [], []>} : vector<8x8xf32>, vector<8x8xf32>, vector<8x8xf32> -> vector<8x8xf32>
    %c16 = arith.constant 16 : index
    %c0_29 = arith.constant 0 : index
    %65 = vector.load %arg5[%c16, %c0_29] : memref<32x32xf32, #tpu.memory_space<vmem>>, vector<8x32xf32>
    %cst_30 = arith.constant dense<0.000000e+00> : vector<8x32xf32>
    %66 = tpu.matmul %64, %65, %cst_30 {dimension_numbers = #tpu.dot_dimension_numbers<[1], [0], [0], [1], [0, 0, 1, 1], [], []>} : vector<8x8xf32>, vector<8x32xf32>, vector<8x32xf32> -> vector<8x32xf32>
    %67 = arith.addf %50, %66 : vector<8x32xf32>
    %68 = vector.extract_strided_slice %14 {offsets = [0, 24], sizes = [8, 8], strides = [1, 1]} : vector<8x32xf32> to vector<8x8xf32>
    %69 = vector.extract_strided_slice %15 {offsets = [0, 24], sizes = [8, 8], strides = [1, 1]} : vector<8x32xf32> to vector<8x8xf32>
    %cst_31 = arith.constant dense<0.000000e+00> : vector<8x8xf32>
    %70 = tpu.matmul %68, %69, %cst_31 {dimension_numbers = #tpu.dot_dimension_numbers<[1], [1], [0], [0], [0, 0, 1, 0], [], []>} : vector<8x8xf32>, vector<8x8xf32>, vector<8x8xf32> -> vector<8x8xf32>
    %cst_32 = arith.constant dense<0xFF800000> : vector<8xf32>
    %71 = vector.multi_reduction <maximumf>, %70, %cst_32 [1] : vector<8x8xf32> to vector<8xf32>
    %72 = vector.shape_cast %71 : vector<8xf32> to vector<8x1xf32>
    %73 = vector.broadcast %72 : vector<8x1xf32> to vector<8x8xf32>
    %74 = arith.subf %70, %73 : vector<8x8xf32>
    %75 = math.exp %74 : vector<8x8xf32>
    %cst_33 = arith.constant dense<0.000000e+00> : vector<8xf32>
    %76 = vector.multi_reduction <add>, %75, %cst_33 [1] : vector<8x8xf32> to vector<8xf32>
    %77 = vector.shape_cast %76 : vector<8xf32> to vector<8x1xf32>
    %78 = tpu.reciprocal %77 {approx = true} : vector<8x1xf32> -> vector<8x1xf32>
    %79 = vector.broadcast %78 : vector<8x1xf32> to vector<8x8xf32>
    %80 = arith.mulf %75, %79 : vector<8x8xf32>
    %cst_34 = arith.constant dense<0.000000e+00> : vector<8x8xf32>
    %81 = tpu.matmul %80, %69, %cst_34 {dimension_numbers = #tpu.dot_dimension_numbers<[1], [0], [0], [1], [0, 0, 1, 1], [], []>} : vector<8x8xf32>, vector<8x8xf32>, vector<8x8xf32> -> vector<8x8xf32>
    %c24 = arith.constant 24 : index
    %c0_35 = arith.constant 0 : index
    %82 = vector.load %arg5[%c24, %c0_35] : memref<32x32xf32, #tpu.memory_space<vmem>>, vector<8x32xf32>
    %cst_36 = arith.constant dense<0.000000e+00> : vector<8x32xf32>
    %83 = tpu.matmul %81, %82, %cst_36 {dimension_numbers = #tpu.dot_dimension_numbers<[1], [0], [0], [1], [0, 0, 1, 1], [], []>} : vector<8x8xf32>, vector<8x32xf32>, vector<8x32xf32> -> vector<8x32xf32>
    %84 = arith.addf %67, %83 : vector<8x32xf32>
    %85 = vector.extract_strided_slice %13 {offsets = [8, 0], sizes = [8, 32], strides = [1, 1]} : vector<16x32xf32> to vector<8x32xf32>
    %86 = vector.extract_strided_slice %11 {offsets = [8, 0], sizes = [8, 32], strides = [1, 1]} : vector<16x32xf32> to vector<8x32xf32>
    %cst_37 = arith.constant 0.000000e+00 : f32
    %87 = vector.broadcast %cst_37 : f32 to vector<8x32xf32>
    %88 = vector.extract_strided_slice %85 {offsets = [0, 0], sizes = [8, 8], strides = [1, 1]} : vector<8x32xf32> to vector<8x8xf32>
    %89 = vector.extract_strided_slice %86 {offsets = [0, 0], sizes = [8, 8], strides = [1, 1]} : vector<8x32xf32> to vector<8x8xf32>
    %cst_38 = arith.constant dense<0.000000e+00> : vector<8x8xf32>
    %90 = tpu.matmul %88, %89, %cst_38 {dimension_numbers = #tpu.dot_dimension_numbers<[1], [1], [0], [0], [0, 0, 1, 0], [], []>} : vector<8x8xf32>, vector<8x8xf32>, vector<8x8xf32> -> vector<8x8xf32>
    %cst_39 = arith.constant dense<0xFF800000> : vector<8xf32>
    %91 = vector.multi_reduction <maximumf>, %90, %cst_39 [1] : vector<8x8xf32> to vector<8xf32>
    %92 = vector.shape_cast %91 : vector<8xf32> to vector<8x1xf32>
    %93 = vector.broadcast %92 : vector<8x1xf32> to vector<8x8xf32>
    %94 = arith.subf %90, %93 : vector<8x8xf32>
    %95 = math.exp %94 : vector<8x8xf32>
    %cst_40 = arith.constant dense<0.000000e+00> : vector<8xf32>
    %96 = vector.multi_reduction <add>, %95, %cst_40 [1] : vector<8x8xf32> to vector<8xf32>
    %97 = vector.shape_cast %96 : vector<8xf32> to vector<8x1xf32>
    %98 = tpu.reciprocal %97 {approx = true} : vector<8x1xf32> -> vector<8x1xf32>
    %99 = vector.broadcast %98 : vector<8x1xf32> to vector<8x8xf32>
    %100 = arith.mulf %95, %99 : vector<8x8xf32>
    %cst_41 = arith.constant dense<0.000000e+00> : vector<8x8xf32>
    %101 = tpu.matmul %100, %89, %cst_41 {dimension_numbers = #tpu.dot_dimension_numbers<[1], [0], [0], [1], [0, 0, 1, 1], [], []>} : vector<8x8xf32>, vector<8x8xf32>, vector<8x8xf32> -> vector<8x8xf32>
    %c0_42 = arith.constant 0 : index
    %c0_43 = arith.constant 0 : index
    %102 = vector.load %arg5[%c0_42, %c0_43] : memref<32x32xf32, #tpu.memory_space<vmem>>, vector<8x32xf32>
    %cst_44 = arith.constant dense<0.000000e+00> : vector<8x32xf32>
    %103 = tpu.matmul %101, %102, %cst_44 {dimension_numbers = #tpu.dot_dimension_numbers<[1], [0], [0], [1], [0, 0, 1, 1], [], []>} : vector<8x8xf32>, vector<8x32xf32>, vector<8x32xf32> -> vector<8x32xf32>
    %104 = arith.addf %87, %103 : vector<8x32xf32>
    %105 = vector.extract_strided_slice %85 {offsets = [0, 8], sizes = [8, 8], strides = [1, 1]} : vector<8x32xf32> to vector<8x8xf32>
    %106 = vector.extract_strided_slice %86 {offsets = [0, 8], sizes = [8, 8], strides = [1, 1]} : vector<8x32xf32> to vector<8x8xf32>
    %cst_45 = arith.constant dense<0.000000e+00> : vector<8x8xf32>
    %107 = tpu.matmul %105, %106, %cst_45 {dimension_numbers = #tpu.dot_dimension_numbers<[1], [1], [0], [0], [0, 0, 1, 0], [], []>} : vector<8x8xf32>, vector<8x8xf32>, vector<8x8xf32> -> vector<8x8xf32>
    %cst_46 = arith.constant dense<0xFF800000> : vector<8xf32>
    %108 = vector.multi_reduction <maximumf>, %107, %cst_46 [1] : vector<8x8xf32> to vector<8xf32>
    %109 = vector.shape_cast %108 : vector<8xf32> to vector<8x1xf32>
    %110 = vector.broadcast %109 : vector<8x1xf32> to vector<8x8xf32>
    %111 = arith.subf %107, %110 : vector<8x8xf32>
    %112 = math.exp %111 : vector<8x8xf32>
    %cst_47 = arith.constant dense<0.000000e+00> : vector<8xf32>
    %113 = vector.multi_reduction <add>, %112, %cst_47 [1] : vector<8x8xf32> to vector<8xf32>
    %114 = vector.shape_cast %113 : vector<8xf32> to vector<8x1xf32>
    %115 = tpu.reciprocal %114 {approx = true} : vector<8x1xf32> -> vector<8x1xf32>
    %116 = vector.broadcast %115 : vector<8x1xf32> to vector<8x8xf32>
    %117 = arith.mulf %112, %116 : vector<8x8xf32>
    %cst_48 = arith.constant dense<0.000000e+00> : vector<8x8xf32>
    %118 = tpu.matmul %117, %106, %cst_48 {dimension_numbers = #tpu.dot_dimension_numbers<[1], [0], [0], [1], [0, 0, 1, 1], [], []>} : vector<8x8xf32>, vector<8x8xf32>, vector<8x8xf32> -> vector<8x8xf32>
    %c8_49 = arith.constant 8 : index
    %c0_50 = arith.constant 0 : index
    %119 = vector.load %arg5[%c8_49, %c0_50] : memref<32x32xf32, #tpu.memory_space<vmem>>, vector<8x32xf32>
    %cst_51 = arith.constant dense<0.000000e+00> : vector<8x32xf32>
    %120 = tpu.matmul %118, %119, %cst_51 {dimension_numbers = #tpu.dot_dimension_numbers<[1], [0], [0], [1], [0, 0, 1, 1], [], []>} : vector<8x8xf32>, vector<8x32xf32>, vector<8x32xf32> -> vector<8x32xf32>
    %121 = arith.addf %104, %120 : vector<8x32xf32>
    %122 = vector.extract_strided_slice %85 {offsets = [0, 16], sizes = [8, 8], strides = [1, 1]} : vector<8x32xf32> to vector<8x8xf32>
    %123 = vector.extract_strided_slice %86 {offsets = [0, 16], sizes = [8, 8], strides = [1, 1]} : vector<8x32xf32> to vector<8x8xf32>
    %cst_52 = arith.constant dense<0.000000e+00> : vector<8x8xf32>
    %124 = tpu.matmul %122, %123, %cst_52 {dimension_numbers = #tpu.dot_dimension_numbers<[1], [1], [0], [0], [0, 0, 1, 0], [], []>} : vector<8x8xf32>, vector<8x8xf32>, vector<8x8xf32> -> vector<8x8xf32>
    %cst_53 = arith.constant dense<0xFF800000> : vector<8xf32>
    %125 = vector.multi_reduction <maximumf>, %124, %cst_53 [1] : vector<8x8xf32> to vector<8xf32>
    %126 = vector.shape_cast %125 : vector<8xf32> to vector<8x1xf32>
    %127 = vector.broadcast %126 : vector<8x1xf32> to vector<8x8xf32>
    %128 = arith.subf %124, %127 : vector<8x8xf32>
    %129 = math.exp %128 : vector<8x8xf32>
    %cst_54 = arith.constant dense<0.000000e+00> : vector<8xf32>
    %130 = vector.multi_reduction <add>, %129, %cst_54 [1] : vector<8x8xf32> to vector<8xf32>
    %131 = vector.shape_cast %130 : vector<8xf32> to vector<8x1xf32>
    %132 = tpu.reciprocal %131 {approx = true} : vector<8x1xf32> -> vector<8x1xf32>
    %133 = vector.broadcast %132 : vector<8x1xf32> to vector<8x8xf32>
    %134 = arith.mulf %129, %133 : vector<8x8xf32>
    %cst_55 = arith.constant dense<0.000000e+00> : vector<8x8xf32>
    %135 = tpu.matmul %134, %123, %cst_55 {dimension_numbers = #tpu.dot_dimension_numbers<[1], [0], [0], [1], [0, 0, 1, 1], [], []>} : vector<8x8xf32>, vector<8x8xf32>, vector<8x8xf32> -> vector<8x8xf32>
    %c16_56 = arith.constant 16 : index
    %c0_57 = arith.constant 0 : index
    %136 = vector.load %arg5[%c16_56, %c0_57] : memref<32x32xf32, #tpu.memory_space<vmem>>, vector<8x32xf32>
    %cst_58 = arith.constant dense<0.000000e+00> : vector<8x32xf32>
    %137 = tpu.matmul %135, %136, %cst_58 {dimension_numbers = #tpu.dot_dimension_numbers<[1], [0], [0], [1], [0, 0, 1, 1], [], []>} : vector<8x8xf32>, vector<8x32xf32>, vector<8x32xf32> -> vector<8x32xf32>
    %138 = arith.addf %121, %137 : vector<8x32xf32>
    %139 = vector.extract_strided_slice %85 {offsets = [0, 24], sizes = [8, 8], strides = [1, 1]} : vector<8x32xf32> to vector<8x8xf32>
    %140 = vector.extract_strided_slice %86 {offsets = [0, 24], sizes = [8, 8], strides = [1, 1]} : vector<8x32xf32> to vector<8x8xf32>
    %cst_59 = arith.constant dense<0.000000e+00> : vector<8x8xf32>
    %141 = tpu.matmul %139, %140, %cst_59 {dimension_numbers = #tpu.dot_dimension_numbers<[1], [1], [0], [0], [0, 0, 1, 0], [], []>} : vector<8x8xf32>, vector<8x8xf32>, vector<8x8xf32> -> vector<8x8xf32>
    %cst_60 = arith.constant dense<0xFF800000> : vector<8xf32>
    %142 = vector.multi_reduction <maximumf>, %141, %cst_60 [1] : vector<8x8xf32> to vector<8xf32>
    %143 = vector.shape_cast %142 : vector<8xf32> to vector<8x1xf32>
    %144 = vector.broadcast %143 : vector<8x1xf32> to vector<8x8xf32>
    %145 = arith.subf %141, %144 : vector<8x8xf32>
    %146 = math.exp %145 : vector<8x8xf32>
    %cst_61 = arith.constant dense<0.000000e+00> : vector<8xf32>
    %147 = vector.multi_reduction <add>, %146, %cst_61 [1] : vector<8x8xf32> to vector<8xf32>
    %148 = vector.shape_cast %147 : vector<8xf32> to vector<8x1xf32>
    %149 = tpu.reciprocal %148 {approx = true} : vector<8x1xf32> -> vector<8x1xf32>
    %150 = vector.broadcast %149 : vector<8x1xf32> to vector<8x8xf32>
    %151 = arith.mulf %146, %150 : vector<8x8xf32>
    %cst_62 = arith.constant dense<0.000000e+00> : vector<8x8xf32>
    %152 = tpu.matmul %151, %140, %cst_62 {dimension_numbers = #tpu.dot_dimension_numbers<[1], [0], [0], [1], [0, 0, 1, 1], [], []>} : vector<8x8xf32>, vector<8x8xf32>, vector<8x8xf32> -> vector<8x8xf32>
    %c24_63 = arith.constant 24 : index
    %c0_64 = arith.constant 0 : index
    %153 = vector.load %arg5[%c24_63, %c0_64] : memref<32x32xf32, #tpu.memory_space<vmem>>, vector<8x32xf32>
    %cst_65 = arith.constant dense<0.000000e+00> : vector<8x32xf32>
    %154 = tpu.matmul %152, %153, %cst_65 {dimension_numbers = #tpu.dot_dimension_numbers<[1], [0], [0], [1], [0, 0, 1, 1], [], []>} : vector<8x8xf32>, vector<8x32xf32>, vector<8x32xf32> -> vector<8x32xf32>
    %155 = arith.addf %138, %154 : vector<8x32xf32>
    %156 = tpu.concatenate %84, %155 in 0 : vector<8x32xf32>, vector<8x32xf32> -> vector<16x32xf32>
    %c0_66 = arith.constant 0 : index
    %c0_67 = arith.constant 0 : index
    %157 = vector.load %arg6[%c0_66, %c0_67] : memref<1x32xf32, #tpu.memory_space<vmem>>, vector<1x32xf32>
    %158 = vector.broadcast %157 : vector<1x32xf32> to vector<16x32xf32>
    %159 = arith.addf %156, %158 : vector<16x32xf32>
    %160 = arith.addf %159, %6 : vector<16x32xf32>
    %c0_68 = arith.constant 0 : index
    %c0_69 = arith.constant 0 : index
    %161 = vector.load %arg7[%c0_68, %c0_69] : memref<1x32xf32, #tpu.memory_space<vmem>>, vector<1x32xf32>
    %c0_70 = arith.constant 0 : index
    %c0_71 = arith.constant 0 : index
    %162 = vector.load %arg8[%c0_70, %c0_71] : memref<1x32xf32, #tpu.memory_space<vmem>>, vector<1x32xf32>
    %cst_72 = arith.constant dense<0.000000e+00> : vector<16xf32>
    %163 = vector.multi_reduction <add>, %160, %cst_72 [1] : vector<16x32xf32> to vector<16xf32>
    %164 = vector.shape_cast %163 : vector<16xf32> to vector<16x1xf32>
    %cst_73 = arith.constant 3.200000e+01 : f32
    %165 = vector.broadcast %cst_73 : f32 to vector<16x1xf32>
    %166 = arith.divf %164, %165 : vector<16x1xf32>
    %167 = vector.broadcast %166 : vector<16x1xf32> to vector<16x32xf32>
    %168 = arith.subf %160, %167 : vector<16x32xf32>
    %169 = arith.mulf %168, %168 : vector<16x32xf32>
    %cst_74 = arith.constant dense<0.000000e+00> : vector<16xf32>
    %170 = vector.multi_reduction <add>, %169, %cst_74 [1] : vector<16x32xf32> to vector<16xf32>
    %171 = vector.shape_cast %170 : vector<16xf32> to vector<16x1xf32>
    %cst_75 = arith.constant 3.200000e+01 : f32
    %172 = vector.broadcast %cst_75 : f32 to vector<16x1xf32>
    %173 = arith.divf %171, %172 : vector<16x1xf32>
    %174 = vector.broadcast %166 : vector<16x1xf32> to vector<16x32xf32>
    %175 = arith.subf %160, %174 : vector<16x32xf32>
    %cst_76 = arith.constant 9.99999974E-6 : f32
    %176 = vector.broadcast %cst_76 : f32 to vector<16x1xf32>
    %177 = arith.addf %173, %176 : vector<16x1xf32>
    %178 = math.rsqrt %177 : vector<16x1xf32>
    %179 = vector.broadcast %178 : vector<16x1xf32> to vector<16x32xf32>
    %180 = arith.mulf %175, %179 : vector<16x32xf32>
    %181 = vector.broadcast %161 : vector<1x32xf32> to vector<16x32xf32>
    %182 = arith.mulf %180, %181 : vector<16x32xf32>
    %183 = vector.broadcast %162 : vector<1x32xf32> to vector<16x32xf32>
    %184 = arith.addf %182, %183 : vector<16x32xf32>
    %185 = arith.truncf %184 : vector<16x32xf32> to vector<16x32xbf16>
    %c0_77 = arith.constant 0 : index
    %c0_78 = arith.constant 0 : index
    %186 = vector.load %arg9[%c0_77, %c0_78] : memref<32x64xbf16, #tpu.memory_space<vmem>>, vector<32x64xbf16>
    %cst_79 = arith.constant dense<0.000000e+00> : vector<16x64xf32>
    %187 = tpu.matmul %185, %186, %cst_79 {dimension_numbers = #tpu.dot_dimension_numbers<[1], [0], [0], [1], [0, 0, 1, 1], [], []>} : vector<16x32xbf16>, vector<32x64xbf16>, vector<16x64xf32> -> vector<16x64xf32>
    %c0_80 = arith.constant 0 : index
    %c0_81 = arith.constant 0 : index
    %188 = vector.load %arg10[%c0_80, %c0_81] : memref<1x64xf32, #tpu.memory_space<vmem>>, vector<1x64xf32>
    %189 = vector.broadcast %188 : vector<1x64xf32> to vector<16x64xf32>
    %190 = arith.addf %187, %189 : vector<16x64xf32>
    %cst_82 = arith.constant 0.000000e+00 : f32
    %191 = vector.broadcast %cst_82 : f32 to vector<16x64xf32>
    %192 = arith.maximumf %190, %191 : vector<16x64xf32>
    %193 = arith.truncf %192 : vector<16x64xf32> to vector<16x64xbf16>
    %c0_83 = arith.constant 0 : index
    %c0_84 = arith.constant 0 : index
    %194 = vector.load %arg11[%c0_83, %c0_84] : memref<64x32xbf16, #tpu.memory_space<vmem>>, vector<64x32xbf16>
    %cst_85 = arith.constant dense<0.000000e+00> : vector<16x32xf32>
    %195 = tpu.matmul %193, %194, %cst_85 {dimension_numbers = #tpu.dot_dimension_numbers<[1], [0], [0], [1], [0, 0, 1, 1], [], []>} : vector<16x64xbf16>, vector<64x32xbf16>, vector<16x32xf32> -> vector<16x32xf32>
    %c0_86 = arith.constant 0 : index
    %c0_87 = arith.constant 0 : index
    %196 = vector.load %arg12[%c0_86, %c0_87] : memref<1x32xf32, #tpu.memory_space<vmem>>, vector<1x32xf32>
    %197 = vector.broadcast %196 : vector<1x32xf32> to vector<16x32xf32>
    %198 = arith.addf %195, %197 : vector<16x32xf32>
    %199 = arith.addf %198, %184 : vector<16x32xf32>
    %c0_88 = arith.constant 0 : index
    %c0_89 = arith.constant 0 : index
    %200 = vector.load %arg13[%c0_88, %c0_89] : memref<1x32xf32, #tpu.memory_space<vmem>>, vector<1x32xf32>
    %c0_90 = arith.constant 0 : index
    %c0_91 = arith.constant 0 : index
    %201 = vector.load %arg14[%c0_90, %c0_91] : memref<1x32xf32, #tpu.memory_space<vmem>>, vector<1x32xf32>
    %cst_92 = arith.constant dense<0.000000e+00> : vector<16xf32>
    %202 = vector.multi_reduction <add>, %199, %cst_92 [1] : vector<16x32xf32> to vector<16xf32>
    %203 = vector.shape_cast %202 : vector<16xf32> to vector<16x1xf32>
    %cst_93 = arith.constant 3.200000e+01 : f32
    %204 = vector.broadcast %cst_93 : f32 to vector<16x1xf32>
    %205 = arith.divf %203, %204 : vector<16x1xf32>
    %206 = vector.broadcast %205 : vector<16x1xf32> to vector<16x32xf32>
    %207 = arith.subf %199, %206 : vector<16x32xf32>
    %208 = arith.mulf %207, %207 : vector<16x32xf32>
    %cst_94 = arith.constant dense<0.000000e+00> : vector<16xf32>
    %209 = vector.multi_reduction <add>, %208, %cst_94 [1] : vector<16x32xf32> to vector<16xf32>
    %210 = vector.shape_cast %209 : vector<16xf32> to vector<16x1xf32>
    %cst_95 = arith.constant 3.200000e+01 : f32
    %211 = vector.broadcast %cst_95 : f32 to vector<16x1xf32>
    %212 = arith.divf %210, %211 : vector<16x1xf32>
    %213 = vector.broadcast %205 : vector<16x1xf32> to vector<16x32xf32>
    %214 = arith.subf %199, %213 : vector<16x32xf32>
    %cst_96 = arith.constant 9.99999974E-6 : f32
    %215 = vector.broadcast %cst_96 : f32 to vector<16x1xf32>
    %216 = arith.addf %212, %215 : vector<16x1xf32>
    %217 = math.rsqrt %216 : vector<16x1xf32>
    %218 = vector.broadcast %217 : vector<16x1xf32> to vector<16x32xf32>
    %219 = arith.mulf %214, %218 : vector<16x32xf32>
    %220 = vector.broadcast %200 : vector<1x32xf32> to vector<16x32xf32>
    %221 = arith.mulf %219, %220 : vector<16x32xf32>
    %222 = vector.broadcast %201 : vector<1x32xf32> to vector<16x32xf32>
    %223 = arith.addf %221, %222 : vector<16x32xf32>
    %224 = arith.truncf %223 : vector<16x32xf32> to vector<16x32xbf16>
    %c0_97 = arith.constant 0 : index
    %c0_98 = arith.constant 0 : index
    %225 = vector.load %arg15[%c0_97, %c0_98] : memref<32x64xbf16, #tpu.memory_space<vmem>>, vector<32x64xbf16>
    %cst_99 = arith.constant dense<0.000000e+00> : vector<16x64xf32>
    %226 = tpu.matmul %224, %225, %cst_99 {dimension_numbers = #tpu.dot_dimension_numbers<[1], [0], [0], [1], [0, 0, 1, 1], [], []>} : vector<16x32xbf16>, vector<32x64xbf16>, vector<16x64xf32> -> vector<16x64xf32>
    %c0_100 = arith.constant 0 : index
    %c0_101 = arith.constant 0 : index
    %227 = vector.load %arg16[%c0_100, %c0_101] : memref<1x64xf32, #tpu.memory_space<vmem>>, vector<1x64xf32>
    %228 = vector.broadcast %227 : vector<1x64xf32> to vector<16x64xf32>
    %229 = arith.addf %226, %228 : vector<16x64xf32>
    %c0_102 = arith.constant 0 : index
    %c0_103 = arith.constant 0 : index
    %230 = vector.load %arg17[%c0_102, %c0_103] : memref<16x64xf32, #tpu.memory_space<vmem>>, vector<16x64xf32>
    tpu.vector_store %arg17[%c0_102, %c0_103], %229 {strides = array<i32>} : memref<16x64xf32, #tpu.memory_space<vmem>>, vector<16x64xf32>,
    return
  }
}

module attributes {stable_mosaic.version = 11 : i64} {
  func.func @encoder_block_kernel(%arg0: memref<16x32xf32, #tpu.memory_space<vmem>>, %arg1: memref<32x32xbf16, #tpu.memory_space<vmem>>, %arg2: memref<1x32xf32, #tpu.memory_space<vmem>>, %arg3: memref<32x32xbf16, #tpu.memory_space<vmem>>, %arg4: memref<1x32xf32, #tpu.memory_space<vmem>>, %arg5: memref<32x32xf32, #tpu.memory_space<vmem>>, %arg6: memref<1x32xf32, #tpu.memory_space<vmem>>, %arg7: memref<1x32xf32, #tpu.memory_space<vmem>>, %arg8: memref<1x32xf32, #tpu.memory_space<vmem>>, %arg9: memref<32x64xbf16, #tpu.memory_space<vmem>>, %arg10: memref<1x64xf32, #tpu.memory_space<vmem>>, %arg11: memref<64x32xbf16, #tpu.memory_space<vmem>>, %arg12: memref<1x32xf32, #tpu.memory_space<vmem>>, %arg13: memref<1x32xf32, #tpu.memory_space<vmem>>, %arg14: memref<1x32xf32, #tpu.memory_space<vmem>>, %arg15: memref<16x32xf32, #tpu.memory_space<vmem>>) attributes {dimension_semantics = [], scalar_prefetch = 0 : i64, scratch_operands = 0 : i64, tpu.core_type = #tpu.core_type<tc>} {
    %c0 = arith.constant 0 : index
    %c0_0 = arith.constant 0 : index
    %0 = vector.load %arg0[%c0, %c0_0] : memref<16x32xf32, #tpu.memory_space<vmem>>, vector<16x32xf32>
    %1 = arith.truncf %0 : vector<16x32xf32> to vector<16x32xbf16>
    %c0_1 = arith.constant 0 : index
    %c0_2 = arith.constant 0 : index
    %2 = vector.load %arg1[%c0_1, %c0_2] : memref<32x32xbf16, #tpu.memory_space<vmem>>, vector<32x32xbf16>
    %cst = arith.constant dense<0.000000e+00> : vector<16x32xf32>
    %3 = tpu.matmul %1, %2, %cst {dimension_numbers = #tpu.dot_dimension_numbers<[1], [0], [0], [1], [0, 0, 1, 1], [], []>} : vector<16x32xbf16>, vector<32x32xbf16>, vector<16x32xf32> -> vector<16x32xf32>
    %c0_3 = arith.constant 0 : index
    %c0_4 = arith.constant 0 : index
    %4 = vector.load %arg2[%c0_3, %c0_4] : memref<1x32xf32, #tpu.memory_space<vmem>>, vector<1x32xf32>
    %5 = vector.broadcast %4 : vector<1x32xf32> to vector<16x32xf32>
    %6 = arith.addf %3, %5 : vector<16x32xf32>
    %c0_5 = arith.constant 0 : index
    %c0_6 = arith.constant 0 : index
    %7 = vector.load %arg3[%c0_5, %c0_6] : memref<32x32xbf16, #tpu.memory_space<vmem>>, vector<32x32xbf16>
    %cst_7 = arith.constant dense<0.000000e+00> : vector<16x32xf32>
    %8 = tpu.matmul %1, %7, %cst_7 {dimension_numbers = #tpu.dot_dimension_numbers<[1], [0], [0], [1], [0, 0, 1, 1], [], []>} : vector<16x32xbf16>, vector<32x32xbf16>, vector<16x32xf32> -> vector<16x32xf32>
    %c0_8 = arith.constant 0 : index
    %c0_9 = arith.constant 0 : index
    %9 = vector.load %arg4[%c0_8, %c0_9] : memref<1x32xf32, #tpu.memory_space<vmem>>, vector<1x32xf32>
    %10 = vector.broadcast %9 : vector<1x32xf32> to vector<16x32xf32>
    %11 = arith.addf %8, %10 : vector<16x32xf32>
    %cst_10 = arith.constant 0.353553385 : f32
    %12 = vector.broadcast %cst_10 : f32 to vector<16x32xf32>
    %13 = arith.mulf %6, %12 : vector<16x32xf32>
    %14 = vector.extract_strided_slice %13 {offsets = [0, 0], sizes = [8, 32], strides = [1, 1]} : vector<16x32xf32> to vector<8x32xf32>
    %15 = vector.extract_strided_slice %11 {offsets = [0, 0], sizes = [8, 32], strides = [1, 1]} : vector<16x32xf32> to vector<8x32xf32>
    %cst_11 = arith.constant 0.000000e+00 : f32
    %16 = vector.broadcast %cst_11 : f32 to vector<8x32xf32>
    %17 = vector.extract_strided_slice %14 {offsets = [0, 0], sizes = [8, 8], strides = [1, 1]} : vector<8x32xf32> to vector<8x8xf32>
    %18 = vector.extract_strided_slice %15 {offsets = [0, 0], sizes = [8, 8], strides = [1, 1]} : vector<8x32xf32> to vector<8x8xf32>
    %cst_12 = arith.constant dense<0.000000e+00> : vector<8x8xf32>
    %19 = tpu.matmul %17, %18, %cst_12 {dimension_numbers = #tpu.dot_dimension_numbers<[1], [1], [0], [0], [0, 0, 1, 0], [], []>} : vector<8x8xf32>, vector<8x8xf32>, vector<8x8xf32> -> vector<8x8xf32>
    %cst_13 = arith.constant dense<0xFF800000> : vector<8xf32>
    %20 = vector.multi_reduction <maximumf>, %19, %cst_13 [1] : vector<8x8xf32> to vector<8xf32>
    %21 = vector.shape_cast %20 : vector<8xf32> to vector<8x1xf32>
    %22 = vector.broadcast %21 : vector<8x1xf32> to vector<8x8xf32>
    %23 = arith.subf %19, %22 : vector<8x8xf32>
    %24 = math.exp %23 : vector<8x8xf32>
    %cst_14 = arith.constant dense<0.000000e+00> : vector<8xf32>
    %25 = vector.multi_reduction <add>, %24, %cst_14 [1] : vector<8x8xf32> to vector<8xf32>
    %26 = vector.shape_cast %25 : vector<8xf32> to vector<8x1xf32>
    %27 = tpu.reciprocal %26 {approx = true} : vector<8x1xf32> -> vector<8x1xf32>
    %28 = vector.broadcast %27 : vector<8x1xf32> to vector<8x8xf32>
    %29 = arith.mulf %24, %28 : vector<8x8xf32>
    %cst_15 = arith.constant dense<0.000000e+00> : vector<8x8xf32>
    %30 = tpu.matmul %29, %18, %cst_15 {dimension_numbers = #tpu.dot_dimension_numbers<[1], [0], [0], [1], [0, 0, 1, 1], [], []>} : vector<8x8xf32>, vector<8x8xf32>, vector<8x8xf32> -> vector<8x8xf32>
    %c0_16 = arith.constant 0 : index
    %c0_17 = arith.constant 0 : index
    %31 = vector.load %arg5[%c0_16, %c0_17] : memref<32x32xf32, #tpu.memory_space<vmem>>, vector<8x32xf32>
    %cst_18 = arith.constant dense<0.000000e+00> : vector<8x32xf32>
    %32 = tpu.matmul %30, %31, %cst_18 {dimension_numbers = #tpu.dot_dimension_numbers<[1], [0], [0], [1], [0, 0, 1, 1], [], []>} : vector<8x8xf32>, vector<8x32xf32>, vector<8x32xf32> -> vector<8x32xf32>
    %33 = arith.addf %16, %32 : vector<8x32xf32>
    %34 = vector.extract_strided_slice %14 {offsets = [0, 8], sizes = [8, 8], strides = [1, 1]} : vector<8x32xf32> to vector<8x8xf32>
    %35 = vector.extract_strided_slice %15 {offsets = [0, 8], sizes = [8, 8], strides = [1, 1]} : vector<8x32xf32> to vector<8x8xf32>
    %cst_19 = arith.constant dense<0.000000e+00> : vector<8x8xf32>
    %36 = tpu.matmul %34, %35, %cst_19 {dimension_numbers = #tpu.dot_dimension_numbers<[1], [1], [0], [0], [0, 0, 1, 0], [], []>} : vector<8x8xf32>, vector<8x8xf32>, vector<8x8xf32> -> vector<8x8xf32>
    %cst_20 = arith.constant dense<0xFF800000> : vector<8xf32>
    %37 = vector.multi_reduction <maximumf>, %36, %cst_20 [1] : vector<8x8xf32> to vector<8xf32>
    %38 = vector.shape_cast %37 : vector<8xf32> to vector<8x1xf32>
    %39 = vector.broadcast %38 : vector<8x1xf32> to vector<8x8xf32>
    %40 = arith.subf %36, %39 : vector<8x8xf32>
    %41 = math.exp %40 : vector<8x8xf32>
    %cst_21 = arith.constant dense<0.000000e+00> : vector<8xf32>
    %42 = vector.multi_reduction <add>, %41, %cst_21 [1] : vector<8x8xf32> to vector<8xf32>
    %43 = vector.shape_cast %42 : vector<8xf32> to vector<8x1xf32>
    %44 = tpu.reciprocal %43 {approx = true} : vector<8x1xf32> -> vector<8x1xf32>
    %45 = vector.broadcast %44 : vector<8x1xf32> to vector<8x8xf32>
    %46 = arith.mulf %41, %45 : vector<8x8xf32>
    %cst_22 = arith.constant dense<0.000000e+00> : vector<8x8xf32>
    %47 = tpu.matmul %46, %35, %cst_22 {dimension_numbers = #tpu.dot_dimension_numbers<[1], [0], [0], [1], [0, 0, 1, 1], [], []>} : vector<8x8xf32>, vector<8x8xf32>, vector<8x8xf32> -> vector<8x8xf32>
    %c8 = arith.constant 8 : index
    %c0_23 = arith.constant 0 : index
    %48 = vector.load %arg5[%c8, %c0_23] : memref<32x32xf32, #tpu.memory_space<vmem>>, vector<8x32xf32>
    %cst_24 = arith.constant dense<0.000000e+00> : vector<8x32xf32>
    %49 = tpu.matmul %47, %48, %cst_24 {dimension_numbers = #tpu.dot_dimension_numbers<[1], [0], [0], [1], [0, 0, 1, 1], [], []>} : vector<8x8xf32>, vector<8x32xf32>, vector<8x32xf32> -> vector<8x32xf32>
    %50 = arith.addf %33, %49 : vector<8x32xf32>
    %51 = vector.extract_strided_slice %14 {offsets = [0, 16], sizes = [8, 8], strides = [1, 1]} : vector<8x32xf32> to vector<8x8xf32>
    %52 = vector.extract_strided_slice %15 {offsets = [0, 16], sizes = [8, 8], strides = [1, 1]} : vector<8x32xf32> to vector<8x8xf32>
    %cst_25 = arith.constant dense<0.000000e+00> : vector<8x8xf32>
    %53 = tpu.matmul %51, %52, %cst_25 {dimension_numbers = #tpu.dot_dimension_numbers<[1], [1], [0], [0], [0, 0, 1, 0], [], []>} : vector<8x8xf32>, vector<8x8xf32>, vector<8x8xf32> -> vector<8x8xf32>
    %cst_26 = arith.constant dense<0xFF800000> : vector<8xf32>
    %54 = vector.multi_reduction <maximumf>, %53, %cst_26 [1] : vector<8x8xf32> to vector<8xf32>
    %55 = vector.shape_cast %54 : vector<8xf32> to vector<8x1xf32>
    %56 = vector.broadcast %55 : vector<8x1xf32> to vector<8x8xf32>
    %57 = arith.subf %53, %56 : vector<8x8xf32>
    %58 = math.exp %57 : vector<8x8xf32>
    %cst_27 = arith.constant dense<0.000000e+00> : vector<8xf32>
    %59 = vector.multi_reduction <add>, %58, %cst_27 [1] : vector<8x8xf32> to vector<8xf32>
    %60 = vector.shape_cast %59 : vector<8xf32> to vector<8x1xf32>
    %61 = tpu.reciprocal %60 {approx = true} : vector<8x1xf32> -> vector<8x1xf32>
    %62 = vector.broadcast %61 : vector<8x1xf32> to vector<8x8xf32>
    %63 = arith.mulf %58, %62 : vector<8x8xf32>
    %cst_28 = arith.constant dense<0.000000e+00> : vector<8x8xf32>
    %64 = tpu.matmul %63, %52, %cst_28 {dimension_numbers = #tpu.dot_dimension_numbers<[1], [0], [0], [1], [0, 0, 1, 1], [], []>} : vector<8x8xf32>, vector<8x8xf32>, vector<8x8xf32> -> vector<8x8xf32>
    %c16 = arith.constant 16 : index
    %c0_29 = arith.constant 0 : index
    %65 = vector.load %arg5[%c16, %c0_29] : memref<32x32xf32, #tpu.memory_space<vmem>>, vector<8x32xf32>
    %cst_30 = arith.constant dense<0.000000e+00> : vector<8x32xf32>
    %66 = tpu.matmul %64, %65, %cst_30 {dimension_numbers = #tpu.dot_dimension_numbers<[1], [0], [0], [1], [0, 0, 1, 1], [], []>} : vector<8x8xf32>, vector<8x32xf32>, vector<8x32xf32> -> vector<8x32xf32>
    %67 = arith.addf %50, %66 : vector<8x32xf32>
    %68 = vector.extract_strided_slice %14 {offsets = [0, 24], sizes = [8, 8], strides = [1, 1]} : vector<8x32xf32> to vector<8x8xf32>
    %69 = vector.extract_strided_slice %15 {offsets = [0, 24], sizes = [8, 8], strides = [1, 1]} : vector<8x32xf32> to vector<8x8xf32>
    %cst_31 = arith.constant dense<0.000000e+00> : vector<8x8xf32>
    %70 = tpu.matmul %68, %69, %cst_31 {dimension_numbers = #tpu.dot_dimension_numbers<[1], [1], [0], [0], [0, 0, 1, 0], [], []>} : vector<8x8xf32>, vector<8x8xf32>, vector<8x8xf32> -> vector<8x8xf32>
    %cst_32 = arith.constant dense<0xFF800000> : vector<8xf32>
    %71 = vector.multi_reduction <maximumf>, %70, %cst_32 [1] : vector<8x8xf32> to vector<8xf32>
    %72 = vector.shape_cast %71 : vector<8xf32> to vector<8x1xf32>
    %73 = vector.broadcast %72 : vector<8x1xf32> to vector<8x8xf32>
    %74 = arith.subf %70, %73 : vector<8x8xf32>
    %75 = math.exp %74 : vector<8x8xf32>
    %cst_33 = arith.constant dense<0.000000e+00> : vector<8xf32>
    %76 = vector.multi_reduction <add>, %75, %cst_33 [1] : vector<8x8xf32> to vector<8xf32>
    %77 = vector.shape_cast %76 : vector<8xf32> to vector<8x1xf32>
    %78 = tpu.reciprocal %77 {approx = true} : vector<8x1xf32> -> vector<8x1xf32>
    %79 = vector.broadcast %78 : vector<8x1xf32> to vector<8x8xf32>
    %80 = arith.mulf %75, %79 : vector<8x8xf32>
    %cst_34 = arith.constant dense<0.000000e+00> : vector<8x8xf32>
    %81 = tpu.matmul %80, %69, %cst_34 {dimension_numbers = #tpu.dot_dimension_numbers<[1], [0], [0], [1], [0, 0, 1, 1], [], []>} : vector<8x8xf32>, vector<8x8xf32>, vector<8x8xf32> -> vector<8x8xf32>
    %c24 = arith.constant 24 : index
    %c0_35 = arith.constant 0 : index
    %82 = vector.load %arg5[%c24, %c0_35] : memref<32x32xf32, #tpu.memory_space<vmem>>, vector<8x32xf32>
    %cst_36 = arith.constant dense<0.000000e+00> : vector<8x32xf32>
    %83 = tpu.matmul %81, %82, %cst_36 {dimension_numbers = #tpu.dot_dimension_numbers<[1], [0], [0], [1], [0, 0, 1, 1], [], []>} : vector<8x8xf32>, vector<8x32xf32>, vector<8x32xf32> -> vector<8x32xf32>
    %84 = arith.addf %67, %83 : vector<8x32xf32>
    %85 = vector.extract_strided_slice %13 {offsets = [8, 0], sizes = [8, 32], strides = [1, 1]} : vector<16x32xf32> to vector<8x32xf32>
    %86 = vector.extract_strided_slice %11 {offsets = [8, 0], sizes = [8, 32], strides = [1, 1]} : vector<16x32xf32> to vector<8x32xf32>
    %cst_37 = arith.constant 0.000000e+00 : f32
    %87 = vector.broadcast %cst_37 : f32 to vector<8x32xf32>
    %88 = vector.extract_strided_slice %85 {offsets = [0, 0], sizes = [8, 8], strides = [1, 1]} : vector<8x32xf32> to vector<8x8xf32>
    %89 = vector.extract_strided_slice %86 {offsets = [0, 0], sizes = [8, 8], strides = [1, 1]} : vector<8x32xf32> to vector<8x8xf32>
    %cst_38 = arith.constant dense<0.000000e+00> : vector<8x8xf32>
    %90 = tpu.matmul %88, %89, %cst_38 {dimension_numbers = #tpu.dot_dimension_numbers<[1], [1], [0], [0], [0, 0, 1, 0], [], []>} : vector<8x8xf32>, vector<8x8xf32>, vector<8x8xf32> -> vector<8x8xf32>
    %cst_39 = arith.constant dense<0xFF800000> : vector<8xf32>
    %91 = vector.multi_reduction <maximumf>, %90, %cst_39 [1] : vector<8x8xf32> to vector<8xf32>
    %92 = vector.shape_cast %91 : vector<8xf32> to vector<8x1xf32>
    %93 = vector.broadcast %92 : vector<8x1xf32> to vector<8x8xf32>
    %94 = arith.subf %90, %93 : vector<8x8xf32>
    %95 = math.exp %94 : vector<8x8xf32>
    %cst_40 = arith.constant dense<0.000000e+00> : vector<8xf32>
    %96 = vector.multi_reduction <add>, %95, %cst_40 [1] : vector<8x8xf32> to vector<8xf32>
    %97 = vector.shape_cast %96 : vector<8xf32> to vector<8x1xf32>
    %98 = tpu.reciprocal %97 {approx = true} : vector<8x1xf32> -> vector<8x1xf32>
    %99 = vector.broadcast %98 : vector<8x1xf32> to vector<8x8xf32>
    %100 = arith.mulf %95, %99 : vector<8x8xf32>
    %cst_41 = arith.constant dense<0.000000e+00> : vector<8x8xf32>
    %101 = tpu.matmul %100, %89, %cst_41 {dimension_numbers = #tpu.dot_dimension_numbers<[1], [0], [0], [1], [0, 0, 1, 1], [], []>} : vector<8x8xf32>, vector<8x8xf32>, vector<8x8xf32> -> vector<8x8xf32>
    %c0_42 = arith.constant 0 : index
    %c0_43 = arith.constant 0 : index
    %102 = vector.load %arg5[%c0_42, %c0_43] : memref<32x32xf32, #tpu.memory_space<vmem>>, vector<8x32xf32>
    %cst_44 = arith.constant dense<0.000000e+00> : vector<8x32xf32>
    %103 = tpu.matmul %101, %102, %cst_44 {dimension_numbers = #tpu.dot_dimension_numbers<[1], [0], [0], [1], [0, 0, 1, 1], [], []>} : vector<8x8xf32>, vector<8x32xf32>, vector<8x32xf32> -> vector<8x32xf32>
    %104 = arith.addf %87, %103 : vector<8x32xf32>
    %105 = vector.extract_strided_slice %85 {offsets = [0, 8], sizes = [8, 8], strides = [1, 1]} : vector<8x32xf32> to vector<8x8xf32>
    %106 = vector.extract_strided_slice %86 {offsets = [0, 8], sizes = [8, 8], strides = [1, 1]} : vector<8x32xf32> to vector<8x8xf32>
    %cst_45 = arith.constant dense<0.000000e+00> : vector<8x8xf32>
    %107 = tpu.matmul %105, %106, %cst_45 {dimension_numbers = #tpu.dot_dimension_numbers<[1], [1], [0], [0], [0, 0, 1, 0], [], []>} : vector<8x8xf32>, vector<8x8xf32>, vector<8x8xf32> -> vector<8x8xf32>
    %cst_46 = arith.constant dense<0xFF800000> : vector<8xf32>
    %108 = vector.multi_reduction <maximumf>, %107, %cst_46 [1] : vector<8x8xf32> to vector<8xf32>
    %109 = vector.shape_cast %108 : vector<8xf32> to vector<8x1xf32>
    %110 = vector.broadcast %109 : vector<8x1xf32> to vector<8x8xf32>
    %111 = arith.subf %107, %110 : vector<8x8xf32>
    %112 = math.exp %111 : vector<8x8xf32>
    %cst_47 = arith.constant dense<0.000000e+00> : vector<8xf32>
    %113 = vector.multi_reduction <add>, %112, %cst_47 [1] : vector<8x8xf32> to vector<8xf32>
    %114 = vector.shape_cast %113 : vector<8xf32> to vector<8x1xf32>
    %115 = tpu.reciprocal %114 {approx = true} : vector<8x1xf32> -> vector<8x1xf32>
    %116 = vector.broadcast %115 : vector<8x1xf32> to vector<8x8xf32>
    %117 = arith.mulf %112, %116 : vector<8x8xf32>
    %cst_48 = arith.constant dense<0.000000e+00> : vector<8x8xf32>
    %118 = tpu.matmul %117, %106, %cst_48 {dimension_numbers = #tpu.dot_dimension_numbers<[1], [0], [0], [1], [0, 0, 1, 1], [], []>} : vector<8x8xf32>, vector<8x8xf32>, vector<8x8xf32> -> vector<8x8xf32>
    %c8_49 = arith.constant 8 : index
    %c0_50 = arith.constant 0 : index
    %119 = vector.load %arg5[%c8_49, %c0_50] : memref<32x32xf32, #tpu.memory_space<vmem>>, vector<8x32xf32>
    %cst_51 = arith.constant dense<0.000000e+00> : vector<8x32xf32>
    %120 = tpu.matmul %118, %119, %cst_51 {dimension_numbers = #tpu.dot_dimension_numbers<[1], [0], [0], [1], [0, 0, 1, 1], [], []>} : vector<8x8xf32>, vector<8x32xf32>, vector<8x32xf32> -> vector<8x32xf32>
    %121 = arith.addf %104, %120 : vector<8x32xf32>
    %122 = vector.extract_strided_slice %85 {offsets = [0, 16], sizes = [8, 8], strides = [1, 1]} : vector<8x32xf32> to vector<8x8xf32>
    %123 = vector.extract_strided_slice %86 {offsets = [0, 16], sizes = [8, 8], strides = [1, 1]} : vector<8x32xf32> to vector<8x8xf32>
    %cst_52 = arith.constant dense<0.000000e+00> : vector<8x8xf32>
    %124 = tpu.matmul %122, %123, %cst_52 {dimension_numbers = #tpu.dot_dimension_numbers<[1], [1], [0], [0], [0, 0, 1, 0], [], []>} : vector<8x8xf32>, vector<8x8xf32>, vector<8x8xf32> -> vector<8x8xf32>
    %cst_53 = arith.constant dense<0xFF800000> : vector<8xf32>
    %125 = vector.multi_reduction <maximumf>, %124, %cst_53 [1] : vector<8x8xf32> to vector<8xf32>
    %126 = vector.shape_cast %125 : vector<8xf32> to vector<8x1xf32>
    %127 = vector.broadcast %126 : vector<8x1xf32> to vector<8x8xf32>
    %128 = arith.subf %124, %127 : vector<8x8xf32>
    %129 = math.exp %128 : vector<8x8xf32>
    %cst_54 = arith.constant dense<0.000000e+00> : vector<8xf32>
    %130 = vector.multi_reduction <add>, %129, %cst_54 [1] : vector<8x8xf32> to vector<8xf32>
    %131 = vector.shape_cast %130 : vector<8xf32> to vector<8x1xf32>
    %132 = tpu.reciprocal %131 {approx = true} : vector<8x1xf32> -> vector<8x1xf32>
    %133 = vector.broadcast %132 : vector<8x1xf32> to vector<8x8xf32>
    %134 = arith.mulf %129, %133 : vector<8x8xf32>
    %cst_55 = arith.constant dense<0.000000e+00> : vector<8x8xf32>
    %135 = tpu.matmul %134, %123, %cst_55 {dimension_numbers = #tpu.dot_dimension_numbers<[1], [0], [0], [1], [0, 0, 1, 1], [], []>} : vector<8x8xf32>, vector<8x8xf32>, vector<8x8xf32> -> vector<8x8xf32>
    %c16_56 = arith.constant 16 : index
    %c0_57 = arith.constant 0 : index
    %136 = vector.load %arg5[%c16_56, %c0_57] : memref<32x32xf32, #tpu.memory_space<vmem>>, vector<8x32xf32>
    %cst_58 = arith.constant dense<0.000000e+00> : vector<8x32xf32>
    %137 = tpu.matmul %135, %136, %cst_58 {dimension_numbers = #tpu.dot_dimension_numbers<[1], [0], [0], [1], [0, 0, 1, 1], [], []>} : vector<8x8xf32>, vector<8x32xf32>, vector<8x32xf32> -> vector<8x32xf32>
    %138 = arith.addf %121, %137 : vector<8x32xf32>
    %139 = vector.extract_strided_slice %85 {offsets = [0, 24], sizes = [8, 8], strides = [1, 1]} : vector<8x32xf32> to vector<8x8xf32>
    %140 = vector.extract_strided_slice %86 {offsets = [0, 24], sizes = [8, 8], strides = [1, 1]} : vector<8x32xf32> to vector<8x8xf32>
    %cst_59 = arith.constant dense<0.000000e+00> : vector<8x8xf32>
    %141 = tpu.matmul %139, %140, %cst_59 {dimension_numbers = #tpu.dot_dimension_numbers<[1], [1], [0], [0], [0, 0, 1, 0], [], []>} : vector<8x8xf32>, vector<8x8xf32>, vector<8x8xf32> -> vector<8x8xf32>
    %cst_60 = arith.constant dense<0xFF800000> : vector<8xf32>
    %142 = vector.multi_reduction <maximumf>, %141, %cst_60 [1] : vector<8x8xf32> to vector<8xf32>
    %143 = vector.shape_cast %142 : vector<8xf32> to vector<8x1xf32>
    %144 = vector.broadcast %143 : vector<8x1xf32> to vector<8x8xf32>
    %145 = arith.subf %141, %144 : vector<8x8xf32>
    %146 = math.exp %145 : vector<8x8xf32>
    %cst_61 = arith.constant dense<0.000000e+00> : vector<8xf32>
    %147 = vector.multi_reduction <add>, %146, %cst_61 [1] : vector<8x8xf32> to vector<8xf32>
    %148 = vector.shape_cast %147 : vector<8xf32> to vector<8x1xf32>
    %149 = tpu.reciprocal %148 {approx = true} : vector<8x1xf32> -> vector<8x1xf32>
    %150 = vector.broadcast %149 : vector<8x1xf32> to vector<8x8xf32>
    %151 = arith.mulf %146, %150 : vector<8x8xf32>
    %cst_62 = arith.constant dense<0.000000e+00> : vector<8x8xf32>
    %152 = tpu.matmul %151, %140, %cst_62 {dimension_numbers = #tpu.dot_dimension_numbers<[1], [0], [0], [1], [0, 0, 1, 1], [], []>} : vector<8x8xf32>, vector<8x8xf32>, vector<8x8xf32> -> vector<8x8xf32>
    %c24_63 = arith.constant 24 : index
    %c0_64 = arith.constant 0 : index
    %153 = vector.load %arg5[%c24_63, %c0_64] : memref<32x32xf32, #tpu.memory_space<vmem>>, vector<8x32xf32>
    %cst_65 = arith.constant dense<0.000000e+00> : vector<8x32xf32>
    %154 = tpu.matmul %152, %153, %cst_65 {dimension_numbers = #tpu.dot_dimension_numbers<[1], [0], [0], [1], [0, 0, 1, 1], [], []>} : vector<8x8xf32>, vector<8x32xf32>, vector<8x32xf32> -> vector<8x32xf32>
    %155 = arith.addf %138, %154 : vector<8x32xf32>
    %156 = tpu.concatenate %84, %155 in 0 : vector<8x32xf32>, vector<8x32xf32> -> vector<16x32xf32>
    %c0_66 = arith.constant 0 : index
    %c0_67 = arith.constant 0 : index
    %157 = vector.load %arg6[%c0_66, %c0_67] : memref<1x32xf32, #tpu.memory_space<vmem>>, vector<1x32xf32>
    %158 = vector.broadcast %157 : vector<1x32xf32> to vector<16x32xf32>
    %159 = arith.addf %156, %158 : vector<16x32xf32>
    %160 = arith.addf %159, %6 : vector<16x32xf32>
    %c0_68 = arith.constant 0 : index
    %c0_69 = arith.constant 0 : index
    %161 = vector.load %arg7[%c0_68, %c0_69] : memref<1x32xf32, #tpu.memory_space<vmem>>, vector<1x32xf32>
    %c0_70 = arith.constant 0 : index
    %c0_71 = arith.constant 0 : index
    %162 = vector.load %arg8[%c0_70, %c0_71] : memref<1x32xf32, #tpu.memory_space<vmem>>, vector<1x32xf32>
    %cst_72 = arith.constant dense<0.000000e+00> : vector<16xf32>
    %163 = vector.multi_reduction <add>, %160, %cst_72 [1] : vector<16x32xf32> to vector<16xf32>
    %164 = vector.shape_cast %163 : vector<16xf32> to vector<16x1xf32>
    %cst_73 = arith.constant 3.200000e+01 : f32
    %165 = vector.broadcast %cst_73 : f32 to vector<16x1xf32>
    %166 = arith.divf %164, %165 : vector<16x1xf32>
    %167 = vector.broadcast %166 : vector<16x1xf32> to vector<16x32xf32>
    %168 = arith.subf %160, %167 : vector<16x32xf32>
    %169 = arith.mulf %168, %168 : vector<16x32xf32>
    %cst_74 = arith.constant dense<0.000000e+00> : vector<16xf32>
    %170 = vector.multi_reduction <add>, %169, %cst_74 [1] : vector<16x32xf32> to vector<16xf32>
    %171 = vector.shape_cast %170 : vector<16xf32> to vector<16x1xf32>
    %cst_75 = arith.constant 3.200000e+01 : f32
    %172 = vector.broadcast %cst_75 : f32 to vector<16x1xf32>
    %173 = arith.divf %171, %172 : vector<16x1xf32>
    %174 = vector.broadcast %166 : vector<16x1xf32> to vector<16x32xf32>
    %175 = arith.subf %160, %174 : vector<16x32xf32>
    %cst_76 = arith.constant 9.99999974E-6 : f32
    %176 = vector.broadcast %cst_76 : f32 to vector<16x1xf32>
    %177 = arith.addf %173, %176 : vector<16x1xf32>
    %178 = math.rsqrt %177 : vector<16x1xf32>
    %179 = vector.broadcast %178 : vector<16x1xf32> to vector<16x32xf32>
    %180 = arith.mulf %175, %179 : vector<16x32xf32>
    %181 = vector.broadcast %161 : vector<1x32xf32> to vector<16x32xf32>
    %182 = arith.mulf %180, %181 : vector<16x32xf32>
    %183 = vector.broadcast %162 : vector<1x32xf32> to vector<16x32xf32>
    %184 = arith.addf %182, %183 : vector<16x32xf32>
    %185 = arith.truncf %184 : vector<16x32xf32> to vector<16x32xbf16>
    %c0_77 = arith.constant 0 : index
    %c0_78 = arith.constant 0 : index
    %186 = vector.load %arg9[%c0_77, %c0_78] : memref<32x64xbf16, #tpu.memory_space<vmem>>, vector<32x64xbf16>
    %cst_79 = arith.constant dense<0.000000e+00> : vector<16x64xf32>
    %187 = tpu.matmul %185, %186, %cst_79 {dimension_numbers = #tpu.dot_dimension_numbers<[1], [0], [0], [1], [0, 0, 1, 1], [], []>} : vector<16x32xbf16>, vector<32x64xbf16>, vector<16x64xf32> -> vector<16x64xf32>
    %c0_80 = arith.constant 0 : index
    %c0_81 = arith.constant 0 : index
    %188 = vector.load %arg10[%c0_80, %c0_81] : memref<1x64xf32, #tpu.memory_space<vmem>>, vector<1x64xf32>
    %189 = vector.broadcast %188 : vector<1x64xf32> to vector<16x64xf32>
    %190 = arith.addf %187, %189 : vector<16x64xf32>
    %cst_82 = arith.constant 0.000000e+00 : f32
    %191 = vector.broadcast %cst_82 : f32 to vector<16x64xf32>
    %192 = arith.maximumf %190, %191 : vector<16x64xf32>
    %193 = arith.truncf %192 : vector<16x64xf32> to vector<16x64xbf16>
    %c0_83 = arith.constant 0 : index
    %c0_84 = arith.constant 0 : index
    %194 = vector.load %arg11[%c0_83, %c0_84] : memref<64x32xbf16, #tpu.memory_space<vmem>>, vector<64x32xbf16>
    %cst_85 = arith.constant dense<0.000000e+00> : vector<16x32xf32>
    %195 = tpu.matmul %193, %194, %cst_85 {dimension_numbers = #tpu.dot_dimension_numbers<[1], [0], [0], [1], [0, 0, 1, 1], [], []>} : vector<16x64xbf16>, vector<64x32xbf16>, vector<16x32xf32> -> vector<16x32xf32>
    %c0_86 = arith.constant 0 : index
    %c0_87 = arith.constant 0 : index
    %196 = vector.load %arg12[%c0_86, %c0_87] : memref<1x32xf32, #tpu.memory_space<vmem>>, vector<1x32xf32>
    %197 = vector.broadcast %196 : vector<1x32xf32> to vector<16x32xf32>
    %198 = arith.addf %195, %197 : vector<16x32xf32>
    %199 = arith.addf %198, %184 : vector<16x32xf32>
    %c0_88 = arith.constant 0 : index
    %c0_89 = arith.constant 0 : index
    %200 = vector.load %arg13[%c0_88, %c0_89] : memref<1x32xf32, #tpu.memory_space<vmem>>, vector<1x32xf32>
    %c0_90 = arith.constant 0 : index
    %c0_91 = arith.constant 0 : index
    %201 = vector.load %arg14[%c0_90, %c0_91] : memref<1x32xf32, #tpu.memory_space<vmem>>, vector<1x32xf32>
    %cst_92 = arith.constant dense<0.000000e+00> : vector<16xf32>
    %202 = vector.multi_reduction <add>, %199, %cst_92 [1] : vector<16x32xf32> to vector<16xf32>
    %203 = vector.shape_cast %202 : vector<16xf32> to vector<16x1xf32>
    %cst_93 = arith.constant 3.200000e+01 : f32
    %204 = vector.broadcast %cst_93 : f32 to vector<16x1xf32>
    %205 = arith.divf %203, %204 : vector<16x1xf32>
    %206 = vector.broadcast %205 : vector<16x1xf32> to vector<16x32xf32>
    %207 = arith.subf %199, %206 : vector<16x32xf32>
    %208 = arith.mulf %207, %207 : vector<16x32xf32>
    %cst_94 = arith.constant dense<0.000000e+00> : vector<16xf32>
    %209 = vector.multi_reduction <add>, %208, %cst_94 [1] : vector<16x32xf32> to vector<16xf32>
    %210 = vector.shape_cast %209 : vector<16xf32> to vector<16x1xf32>
    %cst_95 = arith.constant 3.200000e+01 : f32
    %211 = vector.broadcast %cst_95 : f32 to vector<16x1xf32>
    %212 = arith.divf %210, %211 : vector<16x1xf32>
    %213 = vector.broadcast %205 : vector<16x1xf32> to vector<16x32xf32>
    %214 = arith.subf %199, %213 : vector<16x32xf32>
    %cst_96 = arith.constant 9.99999974E-6 : f32
    %215 = vector.broadcast %cst_96 : f32 to vector<16x1xf32>
    %216 = arith.addf %212, %215 : vector<16x1xf32>
    %217 = math.rsqrt %216 : vector<16x1xf32>
    %218 = vector.broadcast %217 : vector<16x1xf32> to vector<16x32xf32>
    %219 = arith.mulf %214, %218 : vector<16x32xf32>
    %220 = vector.broadcast %200 : vector<1x32xf32> to vector<16x32xf32>
    %221 = arith.mulf %219, %220 : vector<16x32xf32>
    %222 = vector.broadcast %201 : vector<1x32xf32> to vector<16x32xf32>
    %223 = arith.addf %221, %222 : vector<16x32xf32>
    %c0_97 = arith.constant 0 : index
    %c0_98 = arith.constant 0 : index
    %224 = vector.load %arg15[%c0_97, %c0_98] : memref<16x32xf32, #tpu.memory_space<vmem>>, vector<16x32xf32>
    tpu.vector_store %arg15[%c0_97, %c0_98], %223 {strides = array<i32>} : memref<16x32xf32, #tpu.memory_space<vmem>>, vector<16x32xf32>,
    return
  }
}

</mosaic_0001>

<bundles_post_ra>
// kernel: encoder_forward.2
= control target key start
LH: loop header
LB: loop body
LE: loop exit
PB: predicated region body
PF: predicated region fallthrough
CT: control target
= control target key end

     0   :  { %v2670_v0 = vmov 0.0   ;;  %vm2671_vm0 = vmmov 0   ;;  %vm77_vm1 = vcmask 261120   ;;  %vm188_vm2 = vcmask 64512   ;;  %s2672_s16 = smov 120   ;;  %s3045_s3 = inlined_call_operand.vmem [shape: bf16[32,32], index: 3, kind: input, shape index: {}]   ;;  %s3046_s1 = inlined_call_operand.vmem [shape: bf16[32,32], index: 1, kind: input, shape index: {}]   ;;  %s3047_s0 = inlined_call_operand.vmem [shape: f32[16,32], index: 0, kind: input, shape index: {}]   ;;  %s3048_s4 = inlined_call_operand.vmem [shape: f32[1,32], index: 4, kind: input, shape index: {}]   ;;  %s3049_s2 = inlined_call_operand.vmem [shape: f32[1,32], index: 2, kind: input, shape index: {}]   ;;  %s3050_s5 = inlined_call_operand.vmem [shape: f32[32,32], index: 5, kind: input, shape index: {}]   ;;  %s3051_s6 = inlined_call_operand.vmem [shape: f32[1,32], index: 6, kind: input, shape index: {}]   ;;  %s3052_s9 = inlined_call_operand.vmem [shape: bf16[32,64], index: 9, kind: input, shape index: {}]   ;;  %s3053_s11 = inlined_call_operand.vmem [shape: bf16[64,32], index: 11, kind: input, shape index: {}]   ;;  %s3054_s7 = inlined_call_operand.vmem [shape: f32[1,32], index: 7, kind: input, shape index: {}]   ;;  %s3055_s8 = inlined_call_operand.vmem [shape: f32[1,32], index: 8, kind: input, shape index: {}]   ;;  %s3056_s10 = inlined_call_operand.vmem [shape: f32[1,64], index: 10, kind: input, shape index: {}]   ;;  %s3057_s12 = inlined_call_operand.vmem [shape: f32[1,32], index: 12, kind: input, shape index: {}]   ;;  %s3058_s13 = inlined_call_operand.vmem [shape: f32[1,32], index: 13, kind: input, shape index: {}]   ;;  %s3059_s14 = inlined_call_operand.vmem [shape: f32[1,32], index: 14, kind: input, shape index: {}]   ;;  %s3060_s15 = inlined_call_operand.vmem [shape: f32[16,32], index: 15, kind: output, shape index: {}]  }
   0x1   :  { %2467 = vmatprep.subr.bf16.mxu1 %v2670_v0  ;;  %2459 = vmatprep.subr.bf16.mxu0 %v2670_v0  ;;  %v2620_v1 = vld [vmem:[%s3045_s3] sm:$0xff]   ;;  %v2622_v3 = vld [vmem:[%s3045_s3 + $0x8] sm:$0xff]   ;;  %vm2245_vm3 = vcmask 523264  }
   0x2   :  { %v2621_v2 = vld [vmem:[%s3046_s1] sm:$0xff]   ;;  %2471 = vmatprep.mubr.msk.bf16.mxu1 %vm2671_vm0, %v2670_v0  ;;  %2463 = vmatprep.mubr.msk.bf16.mxu0 %vm2671_vm0, %v2670_v0  ;;  %v2623_v4 = vld [vmem:[%s3046_s1 + $0x8] sm:$0xff]  }
   0x3   :  { %2468 = vmatpush3.bf16.msra.mxu1 %v2620_v1  ;;  %2460 = vmatpush3.bf16.msra.mxu0 %v2621_v2  ;;  %v51_v5 = vld [vmem:[%s3047_s0] sm:$0xff]  ;;  %v52_v6 = vld [vmem:[%s3047_s0 + $0x8] sm:$0xff] }
   0x4   :  { %2469 = vmatprep.subr.bf16.mxu1 %v2670_v0  ;;  %2461 = vmatprep.subr.bf16.mxu0 %v2670_v0  ;;  %v53_v7 = vpack.c.bf16 %v52_v6, %v51_v5  ;;  %v2346_v8 = vld [vmem:[%s3048_s4] ss:$0 sm:$0xff]  ;;  %s2674_s4 = smov 104   ;;  %v2834_v46 = vld [vmem:[%s3050_s5 + $0x8] sm:$0xff]  ;;  %v2867_v5 = vld [vmem:[%s3050_s5 + $0x10] sm:$0xff] }
   0x5   :  { %v2342_v9 = vld [vmem:[%s3049_s2] ss:$0 sm:$0xff]  ;;  %s2673_s2 = smov 112  }
   0x6   :  { %v2841_v50 = vld [vmem:[%s3050_s5] sm:$0xff] }
   0x7   :  { %2470 = vmatpush3.bf16.msra.mxu1 %v2622_v3  ;;  %2462 = vmatpush3.bf16.msra.mxu0 %v2623_v4 }
   0x8   :  { %2490 = vmatprep.subr.mxu1 %v2670_v0  ;;  %2475 = vmatprep.subr.mxu0 %v2670_v0 }
   0xa   :  { %2472 = vmatmul.mubr.msk.bf16.vlgmr.msra.gmra.mrb[0].mxu1 %vm77_vm1, %v53_v7  ;;  %2464 = vmatmul.mubr.msk.bf16.vlgmr.msra.gmra.mrb[0].mxu0 %vm77_vm1, %v53_v7 }
   0xb   :  { %2492 = vmatprep.mubr.msk.f32.mxu1 %vm2671_vm0, %v2670_v0  ;;  %2477 = vmatprep.mubr.msk.f32.mxu0 %vm2671_vm0, %v2670_v0 }
  0xdd   :  { %v179_v10 = vpop.f32.mrb[0].mxu1  ;;  %v115_v12 = vpop.f32.mrb[0].mxu0 }
  0xde   :  { %v180_v11 = vadd.f32 %v2346_v8, %v179_v10  ;;  %v2473_v13 = vpop.f32.mrb[1].mxu1  ;;  %v2795_v14 = vadd.f32 %v2342_v9, %v115_v12  ;;  %v2465_v16 = vpop.f32.mrb[1].mxu0 }
  0xdf   :  { %v182_v15 = vpop.f32.mrb[2].mxu1  ;;  %v118_v19 = vpop.f32.mrb[2].mxu0 }
  0xe0   :  { %v2797_v17 = vadd.f32 %v2346_v8, %v182_v15  ;;  %352 = vrot.lane.b32.xlu1 %v180_v11, %s2672_s16  ;;  %v2474_v18 = vpop.f32.mrb[3].mxu1  ;;  %2476 = vmatpush3.xpose.msk.msra.mxu0 %vm188_vm2, %v180_v11  ;;  %v2802_v20 = vmul.f32 0.35355338, %v2795_v14  ;;  %v2804_v21 = vadd.f32 %v2342_v9, %v118_v19  ;;  %v2466_v22 = vpop.f32.mrb[3].mxu0 }
  0xe1   :  { %2480 = vmatprep.subr.mxu0 %v2670_v0 }
  0xe2   :  { %v2887_v18 = vmul.f32 0.35355338, %v2804_v21 }
  0xe3   :  { %2478 = vmatmul.mubr.msk.f32.vlgmr.msra.gmra.mrb[4].mxu0 %vm188_vm2, %v2802_v20 }
  0xe4   :  { %2481 = vmatpush3.msra.mxu0 %v180_v11  ;;  %350 = vrot.lane.b32.xlu1 %v2802_v20, %s2672_s16 }
  0xe5   :  { %2482 = vmatprep.mubr.msk.f32.mxu0 %vm2671_vm0, %v2670_v0  ;;  %2485 = vmatprep.subr.mxu0 %v2670_v0 }
 0x152   :  { %v353_v23 = vpop.permute.xlu1 %352 }
 0x153   :  { %2491 = vmatpush3.msra.mxu1 %v353_v23 }
 0x154   :  { %2500 = vmatprep.subr.mxu1 %v2670_v0 }
 0x156   :  { %v351_v35 = vpop.permute.xlu1 %350 }
 0x1b6   :  { %v261_v24 = vpop.f32.mrb[4].mxu0 }
 0x1b7   :  { %v265_v25 = vsel %vm188_vm2, %v261_v24, -inf  ;;  %v2479_v26 = vpop.f32.mrb[5].mxu0 }
 0x1b8   :  { %266 = vmax.xlane.f32.xlu0 %v265_v25  ;;  %v2895_v25 = vld [vmem:[%s3050_s5 + $0x18] sm:$0xff] }
 0x245   :  { %v267_v27 = vpop.xlane.xlu0 %266 }
 0x246   :  { %v268_v28 = vsub.f32 %v261_v24, %v267_v27 }
 0x248   :  { %v269_v29 = vmul.f32 1.442695, %v268_v28 }
 0x24a   :  { %2630 = vpow2.f32 %v269_v29 }
 0x254   :  { %v2631_v30 = vpop.eup %2630 }
 0x255   :  { %v271_v31 = vsel %vm188_vm2, %v2631_v30, 0.0 }
 0x256   :  { %272 = vadd.xlane.f32.xlu0 %v271_v31 }
 0x2e3   :  { %v273_v32 = vpop.xlane.xlu0 %272 }
 0x2e4   :  { %2632 = vrcp.f32 %v273_v32 }
 0x2ee   :  { %v2633_v33 = vpop.eup %2632 }
 0x2ef   :  { %v275_v34 = vmul.f32 %v2633_v33, %v2631_v30 }
 0x2f1   :  { %2483 = vmatmul.mubr.msk.f32.vlgmr.msra.gmra.mrb[6].mxu0 %vm188_vm2, %v275_v34 }
 0x2f2   :  { %2486 = vmatpush3.xpose.msk.msra.mxu0 %vm188_vm2, %v353_v23  ;;  %2487 = vmatprep.mubr.msk.f32.mxu0 %vm2671_vm0, %v2670_v0 }
 0x2f3   :  { %2495 = vmatprep.subr.mxu0 %v2670_v0 }
 0x2f5   :  { %2488 = vmatmul.mubr.msk.f32.vlgmr.msra.gmra.mrb[8].mxu0 %vm188_vm2, %v351_v35 }
 0x2f6   :  { %2497 = vmatprep.mubr.msk.f32.mxu0 %vm2671_vm0, %v2670_v0  ;;  %2496 = vmatpush3.msra.mxu0 %v2834_v46 }
 0x2f7   :  { %2505 = vmatprep.subr.mxu0 %v2670_v0 }
 0x3c4   :  { %v345_v36 = vpop.f32.mrb[6].mxu0 }
 0x3c5   :  { %v2484_v37 = vpop.f32.mrb[7].mxu0 }
 0x3c8   :  { %v424_v38 = vpop.f32.mrb[8].mxu0 }
 0x3c9   :  { %v2489_v39 = vpop.f32.mrb[9].mxu0  ;;  %v428_v40 = vsel %vm188_vm2, %v424_v38, -inf }
 0x3ca   :  { %429 = vmax.xlane.f32.xlu0 %v428_v40 }
 0x3e0   :  { %662 = vrot.lane.b32.xlu0 %v180_v11, %s2673_s2 }
 0x3e4   :  { %660 = vrot.lane.b32.xlu0 %v2802_v20, %s2673_s2 }
 0x457   :  { %v430_v41 = vpop.xlane.xlu0 %429 }
 0x458   :  { %v431_v42 = vsub.f32 %v424_v38, %v430_v41 }
 0x45a   :  { %v432_v43 = vmul.f32 1.442695, %v431_v42 }
 0x45b   :  { %v663_v51 = vpop.permute.xlu0 %662 }
 0x45c   :  { %2634 = vpow2.f32 %v432_v43 }
 0x45f   :  { %v661_v54 = vpop.permute.xlu0 %660 }
 0x466   :  { %v2635_v44 = vpop.eup %2634 }
 0x467   :  { %v434_v45 = vsel %vm188_vm2, %v2635_v44, 0.0 }
 0x468   :  { %435 = vadd.xlane.f32.xlu1 %v434_v45 }
 0x479   :  { %900 = vrot.lane.b32.xlu1 %v180_v11, %s2674_s4 }
 0x4f5   :  { %v436_v47 = vpop.xlane.xlu1 %435 }
 0x4f6   :  { %2636 = vrcp.f32 %v436_v47 }
 0x4f9   :  { %v901_v6 = vpop.permute.xlu1 %900 }
 0x500   :  { %v2637_v48 = vpop.eup %2636 }
 0x501   :  { %v438_v49 = vmul.f32 %v2637_v48, %v2635_v44 }
 0x503   :  { %2493 = vmatmul.mubr.msk.f32.vlgmr.msra.gmra.mrb[4].mxu1 %vm188_vm2, %v438_v49 }
 0x504   :  { %2501 = vmatpush3.msra.mxu1 %v2841_v50  ;;  %2502 = vmatprep.mubr.msk.f32.mxu1 %vm2671_vm0, %v2670_v0 }
 0x505   :  { %2510 = vmatprep.subr.mxu1 %v2670_v0 }
 0x507   :  { %2503 = vmatmul.mubr.msk.f32.vlgmr.msra.gmra.mrb[6].mxu1 %vm188_vm2, %v345_v36 }
 0x508   :  { %2511 = vmatpush3.msra.mxu1 %v663_v51  ;;  %2512 = vmatprep.mubr.msk.f32.mxu1 %vm2671_vm0, %v2670_v0 }
 0x509   :  { %2520 = vmatprep.subr.mxu1 %v2670_v0 }
 0x5d6   :  { %v509_v52 = vpop.f32.mrb[4].mxu1 }
 0x5d7   :  { %v2494_v53 = vpop.f32.mrb[5].mxu1  ;;  %2498 = vmatmul.mubr.msk.f32.vlgmr.msra.gmra.mrb[10].mxu0 %vm188_vm2, %v509_v52 }
 0x5d8   :  { %2506 = vmatpush3.xpose.msk.msra.mxu0 %vm188_vm2, %v663_v51  ;;  %2507 = vmatprep.mubr.msk.f32.mxu0 %vm2671_vm0, %v2670_v0 }
 0x5d9   :  { %2515 = vmatprep.subr.mxu0 %v2670_v0 }
 0x5da   :  { %v656_v55 = vpop.f32.mrb[6].mxu1 }
 0x5db   :  { %v2504_v56 = vpop.f32.mrb[7].mxu1  ;;  %2508 = vmatmul.mubr.msk.f32.vlgmr.msra.gmra.mrb[12].mxu0 %vm188_vm2, %v661_v54 }
 0x5dc   :  { %2517 = vmatprep.mubr.msk.f32.mxu0 %vm2671_vm0, %v2670_v0  ;;  %2516 = vmatpush3.msra.mxu0 %v2867_v5 }
 0x5dd   :  { %2525 = vmatprep.subr.mxu0 %v2670_v0 }
 0x6aa   :  { %v583_v57 = vpop.f32.mrb[10].mxu0 }
 0x6ab   :  { %v657_v58 = vadd.f32 %v656_v55, %v583_v57  ;;  %v2499_v59 = vpop.f32.mrb[11].mxu0 }
 0x6ae   :  { %v734_v60 = vpop.f32.mrb[12].mxu0 }
 0x6af   :  { %v2509_v61 = vpop.f32.mrb[13].mxu0  ;;  %v738_v62 = vsel %vm188_vm2, %v734_v60, -inf }
 0x6b0   :  { %739 = vmax.xlane.f32.xlu0 %v738_v62 }
 0x73d   :  { %v740_v63 = vpop.xlane.xlu0 %739 }
 0x73e   :  { %v741_v1 = vsub.f32 %v734_v60, %v740_v63 }
 0x740   :  { %v742_v2 = vmul.f32 1.442695, %v741_v1 }
 0x742   :  { %2638 = vpow2.f32 %v742_v2 }
 0x74c   :  { %v2639_v3 = vpop.eup %2638 }
 0x74d   :  { %v744_v4 = vsel %vm188_vm2, %v2639_v3, 0.0 }
 0x74e   :  { %745 = vadd.xlane.f32.xlu1 %v744_v4 }
 0x75f   :  { %898 = vrot.lane.b32.xlu1 %v2802_v20, %s2674_s4 }
 0x7db   :  { %v746_v7 = vpop.xlane.xlu1 %745 }
 0x7dc   :  { %2640 = vrcp.f32 %v746_v7 }
 0x7df   :  { %v899_v10 = vpop.permute.xlu1 %898 }
 0x7e6   :  { %v2641_v8 = vpop.eup %2640 }
 0x7e7   :  { %v748_v9 = vmul.f32 %v2641_v8, %v2639_v3 }
 0x7e9   :  { %2513 = vmatmul.mubr.msk.f32.vlgmr.msra.gmra.mrb[8].mxu1 %vm188_vm2, %v748_v9 }
 0x7ea   :  { %2521 = vmatpush3.xpose.msk.msra.mxu1 %vm188_vm2, %v901_v6  ;;  %2522 = vmatprep.mubr.msk.f32.mxu1 %vm2671_vm0, %v2670_v0 }
 0x7eb   :  { %2530 = vmatprep.subr.mxu1 %v2670_v0 }
 0x7ed   :  { %2523 = vmatmul.mubr.msk.f32.vlgmr.msra.gmra.mrb[10].mxu1 %vm188_vm2, %v899_v10 }
 0x7ee   :  { %2532 = vmatprep.mubr.msk.f32.mxu1 %vm2671_vm0, %v2670_v0  ;;  %2531 = vmatpush3.msra.mxu1 %v2895_v25 }
 0x7ef   :  { %2540 = vmatprep.subr.mxu1 %v2670_v0 }
 0x8bc   :  { %v819_v11 = vpop.f32.mrb[8].mxu1 }
 0x8bd   :  { %v2514_v12 = vpop.f32.mrb[9].mxu1  ;;  %2518 = vmatmul.mubr.msk.f32.vlgmr.msra.gmra.mrb[14].mxu0 %vm188_vm2, %v819_v11 }
 0x8be   :  { %2526 = vmatpush3.msra.mxu0 %v901_v6  ;;  %2527 = vmatprep.mubr.msk.f32.mxu0 %vm2671_vm0, %v2670_v0 }
 0x8bf   :  { %2535 = vmatprep.subr.mxu0 %v2670_v0 }
 0x8c0   :  { %v972_v13 = vpop.f32.mrb[10].mxu1 }
 0x8c1   :  { %v2524_v15 = vpop.f32.mrb[11].mxu1  ;;  %v976_v16 = vsel %vm188_vm2, %v972_v13, -inf }
 0x8c2   :  { %977 = vmax.xlane.f32.xlu0 %v976_v16 }
 0x8d8   :  { %1298 = vrot.lane.b32.xlu0 %v2797_v17, %s2672_s16 }
 0x8dc   :  { %1296 = vrot.lane.b32.xlu0 %v2887_v18, %s2672_s16 }
 0x94f   :  { %v978_v19 = vpop.xlane.xlu0 %977 }
 0x950   :  { %v979_v20 = vsub.f32 %v972_v13, %v978_v19 }
 0x952   :  { %v980_v22 = vmul.f32 1.442695, %v979_v20 }
 0x953   :  { %v1299_v32 = vpop.permute.xlu0 %1298 }
 0x954   :  { %2642 = vpow2.f32 %v980_v22 }
 0x957   :  { %v1297_v33 = vpop.permute.xlu0 %1296 }
 0x95e   :  { %v2643_v23 = vpop.eup %2642 }
 0x95f   :  { %v982_v24 = vsel %vm188_vm2, %v2643_v23, 0.0 }
 0x960   :  { %983 = vadd.xlane.f32.xlu1 %v982_v24 }
 0x990   :  { %v893_v26 = vpop.f32.mrb[14].mxu0 }
 0x991   :  { %v897_v27 = vadd.f32 %v893_v26, %v657_v58  ;;  %v2519_v28 = vpop.f32.mrb[15].mxu0 }
 0x9ed   :  { %v984_v29 = vpop.xlane.xlu1 %983 }
 0x9ee   :  { %2644 = vrcp.f32 %v984_v29 }
 0x9f8   :  { %v2645_v30 = vpop.eup %2644 }
 0x9f9   :  { %v986_v31 = vmul.f32 %v2645_v30, %v2643_v23 }
 0x9fb   :  { %2528 = vmatmul.mubr.msk.f32.vlgmr.msra.gmra.mrb[16].mxu0 %vm188_vm2, %v986_v31 }
 0x9fc   :  { %2536 = vmatpush3.xpose.msk.msra.mxu0 %vm188_vm2, %v2797_v17  ;;  %2537 = vmatprep.mubr.msk.f32.mxu0 %vm2671_vm0, %v2670_v0 }
 0x9fd   :  { %2545 = vmatprep.subr.mxu0 %v2670_v0 }
 0x9ff   :  { %2538 = vmatmul.mubr.msk.f32.vlgmr.msra.gmra.mrb[18].mxu0 %vm188_vm2, %v2887_v18 }
 0xa00   :  { %2546 = vmatpush3.xpose.msk.msra.mxu0 %vm188_vm2, %v1299_v32  ;;  %2547 = vmatprep.mubr.msk.f32.mxu0 %vm2671_vm0, %v2670_v0 }
 0xa01   :  { %2555 = vmatprep.subr.mxu0 %v2670_v0 }
 0xa03   :  { %2548 = vmatmul.mubr.msk.f32.vlgmr.msra.gmra.mrb[20].mxu0 %vm188_vm2, %v1297_v33 }
 0xa04   :  { %2556 = vmatpush3.msra.mxu0 %v2834_v46  ;;  %2557 = vmatprep.mubr.msk.f32.mxu0 %vm2671_vm0, %v2670_v0 }
 0xa05   :  { %2565 = vmatprep.subr.mxu0 %v2670_v0 }
 0xace   :  { %v1057_v34 = vpop.f32.mrb[16].mxu0 }
 0xacf   :  { %v2529_v35 = vpop.f32.mrb[17].mxu0  ;;  %2533 = vmatmul.mubr.msk.f32.vlgmr.msra.gmra.mrb[12].mxu1 %vm188_vm2, %v1057_v34 }
 0xad0   :  { %2541 = vmatpush3.msra.mxu1 %v2797_v17  ;;  %2542 = vmatprep.mubr.msk.f32.mxu1 %vm2671_vm0, %v2670_v0 }
 0xad1   :  { %2550 = vmatprep.subr.mxu1 %v2670_v0 }
 0xad2   :  { %v1208_v36 = vpop.f32.mrb[18].mxu0 }
 0xad3   :  { %v2539_v37 = vpop.f32.mrb[19].mxu0  ;;  %v1212_v38 = vsel %vm188_vm2, %v1208_v36, -inf }
 0xad4   :  { %1213 = vmax.xlane.f32.xlu0 %v1212_v38 }
 0xad6   :  { %v1370_v39 = vpop.f32.mrb[20].mxu0 }
 0xad7   :  { %v2549_v40 = vpop.f32.mrb[21].mxu0  ;;  %v1374_v41 = vsel %vm188_vm2, %v1370_v39, -inf }
 0xad8   :  { %1375 = vmax.xlane.f32.xlu1 %v1374_v41 }
 0xaea   :  { %1605 = vrot.lane.b32.xlu0 %v2887_v18, %s2673_s2 }
 0xb61   :  { %v1214_v42 = vpop.xlane.xlu0 %1213 }
 0xb62   :  { %v1215_v43 = vsub.f32 %v1208_v36, %v1214_v42 }
 0xb64   :  { %v1216_v44 = vmul.f32 1.442695, %v1215_v43 }
 0xb65   :  { %v1376_v45 = vpop.xlane.xlu1 %1375 }
 0xb66   :  { %2646 = vpow2.f32 %v1216_v44  ;;  %v1377_v46 = vsub.f32 %v1370_v39, %v1376_v45 }
 0xb68   :  { %v1378_v47 = vmul.f32 1.442695, %v1377_v46 }
 0xb6a   :  { %2648 = vpow2.f32 %v1378_v47 }
 0xb70   :  { %v2647_v48 = vpop.eup %2646 }
 0xb71   :  { %v1218_v49 = vsel %vm188_vm2, %v2647_v48, 0.0 }
 0xb72   :  { %1219 = vadd.xlane.f32.xlu1 %v1218_v49 }
 0xb74   :  { %v2649_v51 = vpop.eup %2648 }
 0xb75   :  { %v1380_v52 = vsel %vm188_vm2, %v2649_v51, 0.0 }
 0xb76   :  { %1381 = vadd.xlane.f32.xlu1 %v1380_v52 }
 0xb87   :  { %1607 = vrot.lane.b32.xlu1 %v2797_v17, %s2673_s2 }
 0xba2   :  { %v1131_v53 = vpop.f32.mrb[12].mxu1 }
 0xba3   :  { %v2929_v54 = vadd.f32 %v1131_v53, %v897_v27  ;;  %v2534_v55 = vpop.f32.mrb[13].mxu1 }
 0xbff   :  { %v1220_v56 = vpop.xlane.xlu1 %1219 }
 0xc00   :  { %2650 = vrcp.f32 %v1220_v56 }
 0xc03   :  { %v1382_v57 = vpop.xlane.xlu1 %1381 }
 0xc04   :  { %2652 = vrcp.f32 %v1382_v57 }
 0xc07   :  { %v1608_v63 = vpop.permute.xlu1 %1607 }
 0xc0a   :  { %v2651_v58 = vpop.eup %2650 }
 0xc0b   :  { %v1222_v59 = vmul.f32 %v2651_v58, %v2647_v48 }
 0xc0d   :  { %2543 = vmatmul.mubr.msk.f32.vlgmr.msra.gmra.mrb[14].mxu1 %vm188_vm2, %v1222_v59 }
 0xc0e   :  { %v2653_v60 = vpop.eup %2652  ;;  %2551 = vmatpush3.msra.mxu1 %v1299_v32  ;;  %2552 = vmatprep.mubr.msk.f32.mxu1 %vm2671_vm0, %v2670_v0 }
 0xc0f   :  { %v1384_v61 = vmul.f32 %v2653_v60, %v2649_v51  ;;  %2560 = vmatprep.subr.mxu1 %v2670_v0 }
 0xc11   :  { %2553 = vmatmul.mubr.msk.f32.vlgmr.msra.gmra.mrb[16].mxu1 %vm188_vm2, %v1384_v61 }
 0xc12   :  { %2561 = vmatpush3.msra.mxu1 %v2841_v50  ;;  %2562 = vmatprep.mubr.msk.f32.mxu1 %vm2671_vm0, %v2670_v0  ;;  %v1606_v50 = vpop.permute.xlu0 %1605 }
 0xc13   :  { %2570 = vmatprep.subr.mxu1 %v2670_v0 }
 0xce0   :  { %v1292_v62 = vpop.f32.mrb[14].mxu1 }
 0xce1   :  { %v2544_v1 = vpop.f32.mrb[15].mxu1  ;;  %2563 = vmatmul.mubr.msk.f32.vlgmr.msra.gmra.mrb[18].mxu1 %vm188_vm2, %v1292_v62  ;;  %v2624_v62 = vld [vmem:[%s3052_s9] sm:$0xff]  }
 0xce2   :  { %2571 = vmatpush3.msra.mxu1 %v1608_v63  ;;  %2572 = vmatprep.mubr.msk.f32.mxu1 %vm2671_vm0, %v2670_v0  ;;  %v2627_v1 = vld [vmem:[%s3053_s11 + $0x8] sm:$0xff]  }
 0xce3   :  { %2580 = vmatprep.subr.mxu1 %v2670_v0 }
 0xce4   :  { %v1455_v2 = vpop.f32.mrb[16].mxu1 }
 0xce5   :  { %v2554_v3 = vpop.f32.mrb[17].mxu1  ;;  %2558 = vmatmul.mubr.msk.f32.vlgmr.msra.gmra.mrb[22].mxu0 %vm188_vm2, %v1455_v2 }
 0xce6   :  { %2566 = vmatpush3.xpose.msk.msra.mxu0 %vm188_vm2, %v1608_v63  ;;  %2567 = vmatprep.mubr.msk.f32.mxu0 %vm2671_vm0, %v2670_v0  ;;  %v2626_v63 = vld [vmem:[%s3053_s11] sm:$0xff]  }
 0xce7   :  { %2575 = vmatprep.subr.mxu0 %v2670_v0 }
 0xce9   :  { %2568 = vmatmul.mubr.msk.f32.vlgmr.msra.gmra.mrb[24].mxu0 %vm188_vm2, %v1606_v50 }
 0xcea   :  { %2576 = vmatpush3.msra.mxu0 %v2867_v5  ;;  %2577 = vmatprep.mubr.msk.f32.mxu0 %vm2671_vm0, %v2670_v0 }
 0xceb   :  { %2585 = vmatprep.subr.mxu0 %v2670_v0 }
 0xdb4   :  { %v1601_v4 = vpop.f32.mrb[18].mxu1 }
 0xdb5   :  { %v2564_v6 = vpop.f32.mrb[19].mxu1 }
 0xdb8   :  { %v1528_v7 = vpop.f32.mrb[22].mxu0 }
 0xdb9   :  { %v1602_v8 = vadd.f32 %v1601_v4, %v1528_v7  ;;  %v2559_v9 = vpop.f32.mrb[23].mxu0 }
 0xdbc   :  { %v1679_v10 = vpop.f32.mrb[24].mxu0 }
 0xdbd   :  { %v2569_v11 = vpop.f32.mrb[25].mxu0  ;;  %v1683_v12 = vsel %vm188_vm2, %v1679_v10, -inf }
 0xdbe   :  { %1684 = vmax.xlane.f32.xlu1 %v1683_v12 }
 0xdcf   :  { %1844 = vrot.lane.b32.xlu1 %v2797_v17, %s2674_s4 }
 0xe4b   :  { %v1685_v13 = vpop.xlane.xlu1 %1684 }
 0xe4c   :  { %v1686_v5 = vsub.f32 %v1679_v10, %v1685_v13  ;;  %v2383_v10 = vld [vmem:[%s3054_s7] ss:$0 sm:$0xff] }
 0xe4e   :  { %v1687_v15 = vmul.f32 1.442695, %v1686_v5  ;;  %v2384_v5 = vld [vmem:[%s3055_s8] ss:$0 sm:$0xff] }
 0xe4f   :  { %v1845_v24 = vpop.permute.xlu1 %1844 }
 0xe50   :  { %2654 = vpow2.f32 %v1687_v15 }
 0xe5a   :  { %v2655_v16 = vpop.eup %2654 }
 0xe5b   :  { %v1689_v19 = vsel %vm188_vm2, %v2655_v16, 0.0 }
 0xe5c   :  { %1690 = vadd.xlane.f32.xlu0 %v1689_v19 }
 0xe72   :  { %1842 = vrot.lane.b32.xlu0 %v2887_v18, %s2674_s4  ;;  %v2382_v18 = vld [vmem:[%s3051_s6] ss:$0 sm:$0xff] }
 0xe73   :  { %v2086_v27 = vadd.f32 %v2382_v18, %v2929_v54 }
 0xe75   :  { %v2088_v31 = vadd.f32 %v2086_v27, %v2795_v14 }
 0xe77   :  { %v2092_v32 = vsel %vm77_vm1, %v2088_v31, 0.0 }
 0xee9   :  { %v1691_v20 = vpop.xlane.xlu0 %1690 }
 0xeea   :  { %2656 = vrcp.f32 %v1691_v20 }
 0xeed   :  { %v1843_v17 = vpop.permute.xlu0 %1842 }
 0xef4   :  { %v2657_v22 = vpop.eup %2656 }
 0xef5   :  { %v1693_v23 = vmul.f32 %v2657_v22, %v2655_v16  ;;  %v2628_v22 = vld [vmem:[%s3053_s11 + $0x10] sm:$0xff]  }
 0xef7   :  { %2573 = vmatmul.mubr.msk.f32.vlgmr.msra.gmra.mrb[20].mxu1 %vm188_vm2, %v1693_v23  ;;  %v2629_v23 = vld [vmem:[%s3053_s11 + $0x18] sm:$0xff]  }
 0xef8   :  { %2581 = vmatpush3.xpose.msk.msra.mxu1 %vm188_vm2, %v1845_v24  ;;  %2582 = vmatprep.mubr.msk.f32.mxu1 %vm2671_vm0, %v2670_v0 }
 0xef9   :  { %2590 = vmatprep.subr.mxu1 %v2670_v0 }
 0xefb   :  { %2583 = vmatmul.mubr.msk.f32.vlgmr.msra.gmra.mrb[22].mxu1 %vm188_vm2, %v1843_v17 }
 0xefc   :  { %2591 = vmatpush3.msra.mxu1 %v2895_v25  ;;  %2592 = vmatprep.mubr.msk.f32.mxu1 %vm2671_vm0, %v2670_v0 }
 0xefd   :  { %2603 = vmatprep.subr.bf16.mxu1 %v2670_v0 }
 0xfca   :  { %v1764_v26 = vpop.f32.mrb[20].mxu1 }
 0xfcb   :  { %v2574_v28 = vpop.f32.mrb[21].mxu1  ;;  %2578 = vmatmul.mubr.msk.f32.vlgmr.msra.gmra.mrb[26].mxu0 %vm188_vm2, %v1764_v26 }
 0xfcc   :  { %2586 = vmatpush3.msra.mxu0 %v1845_v24  ;;  %2587 = vmatprep.mubr.msk.f32.mxu0 %vm2671_vm0, %v2670_v0  ;;  %v2385_v24 = vld [vmem:[%s3056_s10] ss:$0 sm:$0xff] }
 0xfcd   :  { %2595 = vmatprep.subr.bf16.mxu0 %v2670_v0 }
 0xfce   :  { %v1916_v25 = vpop.f32.mrb[22].mxu1 }
 0xfcf   :  { %v2584_v29 = vpop.f32.mrb[23].mxu1  ;;  %v1920_v30 = vsel %vm188_vm2, %v1916_v25, -inf }
 0xfd0   :  { %1921 = vmax.xlane.f32.xlu1 %v1920_v30 }
 0xfd4   :  { %2093 = vadd.xlane.f32.xlu1 %v2092_v32 }
0x105d   :  { %v1922_v33 = vpop.xlane.xlu1 %1921 }
0x105e   :  { %v1923_v34 = vsub.f32 %v1916_v25, %v1922_v33 }
0x1060   :  { %v1924_v35 = vmul.f32 1.442695, %v1923_v34 }
0x1061   :  { %v2094_v45 = vpop.xlane.xlu1 %2093 }
0x1062   :  { %2658 = vpow2.f32 %v1924_v35  ;;  %v2099_v46 = vmul.f32 0.03125, %v2094_v45 }
0x1064   :  { %v2101_v51 = vsub.f32 %v2088_v31, %v2099_v46 }
0x1066   :  { %v2103_v55 = vmul.f32 %v2101_v51, %v2101_v51 }
0x1068   :  { %v2105_v56 = vsel %vm77_vm1, %v2103_v55, 0.0 }
0x106c   :  { %v2659_v36 = vpop.eup %2658 }
0x106d   :  { %v1926_v37 = vsel %vm188_vm2, %v2659_v36, 0.0 }
0x106e   :  { %1927 = vadd.xlane.f32.xlu0 %v1926_v37 }
0x109e   :  { %v1837_v38 = vpop.f32.mrb[26].mxu0 }
0x109f   :  { %v1841_v39 = vadd.f32 %v1837_v38, %v1602_v8  ;;  %v2579_v40 = vpop.f32.mrb[27].mxu0 }
0x10fb   :  { %v1928_v41 = vpop.xlane.xlu0 %1927 }
0x10fc   :  { %2660 = vrcp.f32 %v1928_v41 }
0x1106   :  { %v2661_v42 = vpop.eup %2660 }
0x1107   :  { %v1930_v43 = vmul.f32 %v2661_v42, %v2659_v36 }
0x1109   :  { %2588 = vmatmul.mubr.msk.f32.vlgmr.msra.gmra.mrb[28].mxu0 %vm188_vm2, %v1930_v43 }
0x110a   :  { %2599 = vmatprep.mubr.msk.bf16.mxu0 %vm2671_vm0, %v2670_v0  ;;  %2596 = vmatpush3.bf16.msra.mxu0 %v2624_v62  ;;  %v2396_v62 = vld [vmem:[%s3059_s14] ss:$0 sm:$0xff] }
0x110b   :  { %2597 = vmatprep.subr.bf16.mxu0 %v2670_v0 }
0x11dc   :  { %v2001_v14 = vpop.f32.mrb[28].mxu0 }
0x11dd   :  { %v2589_v44 = vpop.f32.mrb[29].mxu0  ;;  %2593 = vmatmul.mubr.msk.f32.vlgmr.msra.gmra.mrb[24].mxu1 %vm188_vm2, %v2001_v14 }
0x11de   :  { %2611 = vmatprep.mubr.msk.bf16.mxu1 %vm2671_vm0, %v2670_v0  ;;  %2604 = vmatpush3.bf16.msra.mxu1 %v2626_v63 }
0x11df   :  { %2605 = vmatprep.subr.bf16.mxu1 %v2670_v0 }
0x11e2   :  { %2606 = vmatpush3.bf16.msra.mxu1 %v2627_v1 }
0x11e3   :  { %2607 = vmatprep.subr.bf16.mxu1 %v2670_v0 }
0x11e6   :  { %2608 = vmatpush3.bf16.msra.mxu1 %v2628_v22 }
0x11e7   :  { %2609 = vmatprep.subr.bf16.mxu1 %v2670_v0  ;;  %v2389_v0 = vld [vmem:[%s3057_s12] ss:$0 sm:$0xff] }
0x11ea   :  { %2610 = vmatpush3.bf16.msra.mxu1 %v2629_v23 }
0x12b0   :  { %v2074_v47 = vpop.f32.mrb[24].mxu1 }
0x12b1   :  { %v2078_v48 = vadd.f32 %v2074_v47, %v1841_v39  ;;  %v2594_v49 = vpop.f32.mrb[25].mxu1 }
0x12b3   :  { %v2087_v52 = vadd.f32 %v2382_v18, %v2078_v48 }
0x12b5   :  { %v2089_v53 = vadd.f32 %v2087_v52, %v2804_v21  ;;  %v2625_v21 = vld [vmem:[%s3052_s9 + $0x8] sm:$0xff]  }
0x12b6   :  { %2598 = vmatpush3.bf16.msra.mxu0 %v2625_v21 }
0x12b7   :  { %v2095_v54 = vsel %vm77_vm1, %v2089_v53, 0.0 }
0x12b8   :  { %2096 = vadd.xlane.f32.xlu1 %v2095_v54 }
0x12bc   :  { %2106 = vadd.xlane.f32.xlu1 %v2105_v56 }
0x1345   :  { %v2097_v57 = vpop.xlane.xlu1 %2096 }
0x1346   :  { %v2100_v58 = vmul.f32 0.03125, %v2097_v57 }
0x1348   :  { %v2102_v59 = vsub.f32 %v2089_v53, %v2100_v58 }
0x1349   :  { %v2107_v2 = vpop.xlane.xlu1 %2106 }
0x134a   :  { %v2104_v60 = vmul.f32 %v2102_v59, %v2102_v59  ;;  %v2111_v3 = vmul.f32 0.03125, %v2107_v2 }
0x134c   :  { %v2108_v61 = vsel %vm77_vm1, %v2104_v60, 0.0  ;;  %v2113_v50 = vadd.f32 1e-05, %v2111_v3 }
0x134d   :  { %2109 = vadd.xlane.f32.xlu1 %v2108_v61 }
0x134e   :  { %2662 = vrsqrt.f32 %v2113_v50 }
0x1358   :  { %v2663_v8 = vpop.eup %2662 }
0x1359   :  { %v2117_v9 = vmul.f32 %v2663_v8, %v2101_v51 }
0x135b   :  { %v2125_v12 = vmul.f32 %v2383_v10, %v2117_v9 }
0x135d   :  { %v2133_v16 = vadd.f32 %v2384_v5, %v2125_v12 }
0x13da   :  { %v2110_v4 = vpop.xlane.xlu1 %2109 }
0x13db   :  { %v2112_v6 = vmul.f32 0.03125, %v2110_v4 }
0x13dd   :  { %v2114_v7 = vadd.f32 1e-05, %v2112_v6 }
0x13df   :  { %2664 = vrsqrt.f32 %v2114_v7 }
0x13e9   :  { %v2665_v11 = vpop.eup %2664 }
0x13ea   :  { %v2118_v13 = vmul.f32 %v2665_v11, %v2102_v59  ;;  %v2395_v59 = vld [vmem:[%s3058_s13] ss:$0 sm:$0xff] }
0x13ec   :  { %v2126_v15 = vmul.f32 %v2383_v10, %v2118_v13 }
0x13ee   :  { %v2134_v19 = vadd.f32 %v2384_v5, %v2126_v15 }
0x13f0   :  { %v2135_v20 = vpack.c.bf16 %v2134_v19, %v2133_v16 }
0x13f2   :  { %2600 = vmatmul.mubr.msk.bf16.vlgmr.msra.gmra.mrb[32].mxu0 %vm77_vm1, %v2135_v20 }
0x14c5   :  { %v2196_v17 = vpop.f32.mrb[32].mxu0 }
0x14c6   :  { %v2197_v18 = vadd.f32 %v2385_v24, %v2196_v17  ;;  %v2601_v26 = vpop.f32.mrb[33].mxu0 }
0x14c7   :  { %v2199_v27 = vpop.f32.mrb[34].mxu0 }
0x14c8   :  { %v2200_v28 = vadd.f32 %v2385_v24, %v2199_v27  ;;  %v2602_v25 = vpop.f32.mrb[35].mxu0  ;;  %v2203_v29 = vmax.f32 %v2197_v18, 0.0 }
0x14ca   :  { %v2204_v30 = vmax.f32 %v2200_v28, 0.0 }
0x14cc   :  { %v2205_v31 = vpack.c.bf16 %v2204_v30, %v2203_v29 }
0x14ce   :  { %2612 = vmatmul.mubr.msk.bf16.vlgmr.msra.gmra.mrb[28].mxu1 %vm2245_vm3, %v2205_v31 }
0x15a1   :  { %v2283_v32 = vpop.f32.mrb[28].mxu1 }
0x15a2   :  { %v2284_v33 = vadd.f32 %v2389_v0, %v2283_v32  ;;  %v2613_v34 = vpop.f32.mrb[29].mxu1 }
0x15a3   :  { %v2286_v35 = vpop.f32.mrb[30].mxu1 }
0x15a4   :  { %v2287_v36 = vadd.f32 %v2389_v0, %v2286_v35  ;;  %v2614_v37 = vpop.f32.mrb[31].mxu1  ;;  %v2290_v38 = vadd.f32 %v2284_v33, %v2133_v16 }
0x15a6   :  { %v2294_v39 = vsel %vm77_vm1, %v2290_v38, 0.0  ;;  %v2291_v40 = vadd.f32 %v2287_v36, %v2134_v19 }
0x15a7   :  { %2295 = vadd.xlane.f32.xlu0 %v2294_v39 }
0x15a8   :  { %v2297_v41 = vsel %vm77_vm1, %v2291_v40, 0.0 }
0x15a9   :  { %2298 = vadd.xlane.f32.xlu1 %v2297_v41 }
0x1634   :  { %v2296_v42 = vpop.xlane.xlu0 %2295 }
0x1635   :  { %v2300_v43 = vmul.f32 0.03125, %v2296_v42 }
0x1636   :  { %v2299_v14 = vpop.xlane.xlu1 %2298 }
0x1637   :  { %v2302_v44 = vsub.f32 %v2290_v38, %v2300_v43  ;;  %v2301_v45 = vmul.f32 0.03125, %v2299_v14 }
0x1639   :  { %v2303_v46 = vsub.f32 %v2291_v40, %v2301_v45  ;;  %v2304_v47 = vmul.f32 %v2302_v44, %v2302_v44 }
0x163b   :  { %v2306_v48 = vsel %vm77_vm1, %v2304_v47, 0.0  ;;  %v2305_v49 = vmul.f32 %v2303_v46, %v2303_v46 }
0x163c   :  { %2307 = vadd.xlane.f32.xlu0 %v2306_v48 }
0x163d   :  { %v2309_v51 = vsel %vm77_vm1, %v2305_v49, 0.0 }
0x163e   :  { %2310 = vadd.xlane.f32.xlu1 %v2309_v51 }
0x16c9   :  { %v2308_v52 = vpop.xlane.xlu0 %2307 }
0x16ca   :  { %v2312_v53 = vmul.f32 0.03125, %v2308_v52 }
0x16cb   :  { %v2311_v54 = vpop.xlane.xlu1 %2310 }
0x16cc   :  { %v2314_v55 = vadd.f32 1e-05, %v2312_v53  ;;  %v2313_v56 = vmul.f32 0.03125, %v2311_v54 }
0x16ce   :  { %2666 = vrsqrt.f32 %v2314_v55  ;;  %v2315_v57 = vadd.f32 1e-05, %v2313_v56 }
0x16d0   :  { %2668 = vrsqrt.f32 %v2315_v57 }
0x16d8   :  { %v2667_v58 = vpop.eup %2666 }
0x16d9   :  { %v2318_v60 = vmul.f32 %v2667_v58, %v2302_v44 }
0x16da   :  { %v2669_v61 = vpop.eup %2668 }
0x16db   :  { %v2326_v21 = vmul.f32 %v2395_v59, %v2318_v60  ;;  %v2319_v63 = vmul.f32 %v2669_v61, %v2303_v46 }
0x16dd   :  { %v2334_v1 = vadd.f32 %v2396_v62, %v2326_v21  ;;  %v2327_v2 = vmul.f32 %v2395_v59, %v2319_v63 }
0x16df   :  { %2336 = vst.msk [vmem:[%s3060_s15] sm:$0xff] %vm77_vm1, %v2334_v1  ;;  %v2335_v3 = vadd.f32 %v2396_v62, %v2327_v2 }
0x16e1   :  { %2337 = vst.msk [vmem:[%s3060_s15 + $0x8] sm:$0xff] %vm77_vm1, %v2335_v3 }

// kernel: encoder_forward.3
= control target key start
LH: loop header
LB: loop body
LE: loop exit
PB: predicated region body
PF: predicated region fallthrough
CT: control target
= control target key end

     0   :  { %v2761_v0 = vmov 0.0   ;;  %vm2762_vm0 = vmmov 0   ;;  %vm83_vm1 = vcmask 261120   ;;  %vm194_vm2 = vcmask 64512   ;;  %s3161_s1 = inlined_call_operand.vmem [shape: bf16[32,32], index: 1, kind: input, shape index: {}]   ;;  %s3162_s3 = inlined_call_operand.vmem [shape: bf16[32,32], index: 3, kind: input, shape index: {}]   ;;  %s3163_s0 = inlined_call_operand.vmem [shape: f32[16,32], index: 0, kind: input, shape index: {}]   ;;  %s3164_s2 = inlined_call_operand.vmem [shape: f32[1,32], index: 2, kind: input, shape index: {}]   ;;  %s3165_s4 = inlined_call_operand.vmem [shape: f32[1,32], index: 4, kind: input, shape index: {}]   ;;  %s3166_s5 = inlined_call_operand.vmem [shape: f32[32,32], index: 5, kind: input, shape index: {}]   ;;  %s3167_s6 = inlined_call_operand.vmem [shape: f32[1,32], index: 6, kind: input, shape index: {}]   ;;  %s3168_s9 = inlined_call_operand.vmem [shape: bf16[32,64], index: 9, kind: input, shape index: {}]   ;;  %s3169_s11 = inlined_call_operand.vmem [shape: bf16[64,32], index: 11, kind: input, shape index: {}]   ;;  %s3170_s7 = inlined_call_operand.vmem [shape: f32[1,32], index: 7, kind: input, shape index: {}]   ;;  %s3171_s8 = inlined_call_operand.vmem [shape: f32[1,32], index: 8, kind: input, shape index: {}]   ;;  %s3172_s10 = inlined_call_operand.vmem [shape: f32[1,64], index: 10, kind: input, shape index: {}]   ;;  %s3173_s12 = inlined_call_operand.vmem [shape: f32[1,32], index: 12, kind: input, shape index: {}]   ;;  %s3174_s15 = inlined_call_operand.vmem [shape: bf16[32,64], index: 15, kind: input, shape index: {}]   ;;  %s3175_s13 = inlined_call_operand.vmem [shape: f32[1,32], index: 13, kind: input, shape index: {}]   ;;  %s3176_s14 = inlined_call_operand.vmem [shape: f32[1,32], index: 14, kind: input, shape index: {}]   ;;  %s3177_s16 = inlined_call_operand.vmem [shape: f32[1,64], index: 16, kind: input, shape index: {}]   ;;  %s3178_s17 = inlined_call_operand.vmem [shape: f32[16,64], index: 17, kind: output, shape index: {}]  }
   0x1   :  { %3181 = sst [smem:[#allocation2_spill]] %s3161_s1  ;;  %2540 = vmatprep.subr.bf16.mxu0 %v2761_v0  ;;  %2548 = vmatprep.subr.bf16.mxu1 %v2761_v0  ;;  %v57_v5 = vld [vmem:[%s3163_s0] sm:$0xff]  ;;  %v58_v6 = vld [vmem:[%s3163_s0 + $0x8] sm:$0xff]  ;;  %vm2251_vm3 = vcmask 523264  }
   0x2   :  { %3182 = sst [smem:[#allocation3_spill]] %s3162_s3  ;;  %s3183_s26 = sld [smem:[#allocation2_spill]]  ;;  %2544 = vmatprep.mubr.msk.bf16.mxu0 %vm2762_vm0, %v2761_v0  ;;  %2552 = vmatprep.mubr.msk.bf16.mxu1 %vm2762_vm0, %v2761_v0  ;;  %v59_v7 = vpack.c.bf16 %v58_v6, %v57_v5  ;;  %v2416_v8 = vld [vmem:[%s3164_s2] ss:$0 sm:$0xff]  ;;  %v2935_v44 = vld [vmem:[%s3166_s5 + $0x8] sm:$0xff]  ;;  %v2970_v5 = vld [vmem:[%s3166_s5 + $0x10] sm:$0xff] }
   0x3   :  { %s3184_s29 = sld [smem:[#allocation3_spill]]  ;;  %v2420_v9 = vld [vmem:[%s3165_s4] ss:$0 sm:$0xff]  ;;  %s2763_s2 = smov 120  }
   0x4   :  { %s2764_s4 = smov 104   ;;  %v2942_v48 = vld [vmem:[%s3166_s5] sm:$0xff] }
   0x8   :  { %v2709_v1 = vld [vmem:[%s3183_s26] sm:$0xff]   ;;  %v2711_v3 = vld [vmem:[%s3183_s26 + $0x8] sm:$0xff]   ;;  %s2765_s26 = smov 112  }
   0x9   :  { %v2710_v2 = vld [vmem:[%s3184_s29] sm:$0xff]   ;;  %2541 = vmatpush3.bf16.msra.mxu0 %v2709_v1  ;;  %v2712_v4 = vld [vmem:[%s3184_s29 + $0x8] sm:$0xff]  }
   0xa   :  { %2549 = vmatpush3.bf16.msra.mxu1 %v2710_v2  ;;  %2542 = vmatprep.subr.bf16.mxu0 %v2761_v0 }
   0xb   :  { %2550 = vmatprep.subr.bf16.mxu1 %v2761_v0 }
   0xd   :  { %2543 = vmatpush3.bf16.msra.mxu0 %v2711_v3 }
   0xe   :  { %2551 = vmatpush3.bf16.msra.mxu1 %v2712_v4  ;;  %2556 = vmatprep.subr.mxu0 %v2761_v0 }
   0xf   :  { %2561 = vmatprep.subr.mxu1 %v2761_v0 }
  0x10   :  { %2545 = vmatmul.mubr.msk.bf16.vlgmr.msra.gmra.mrb[0].mxu0 %vm83_vm1, %v59_v7 }
  0x11   :  { %2553 = vmatmul.mubr.msk.bf16.vlgmr.msra.gmra.mrb[0].mxu1 %vm83_vm1, %v59_v7  ;;  %2558 = vmatprep.mubr.msk.f32.mxu0 %vm2762_vm0, %v2761_v0 }
  0x12   :  { %2563 = vmatprep.mubr.msk.f32.mxu1 %vm2762_vm0, %v2761_v0 }
  0xe3   :  { %v121_v10 = vpop.f32.mrb[0].mxu0 }
  0xe4   :  { %v2896_v11 = vadd.f32 %v2416_v8, %v121_v10  ;;  %v185_v12 = vpop.f32.mrb[0].mxu1  ;;  %v2546_v13 = vpop.f32.mrb[1].mxu0 }
  0xe5   :  { %v186_v14 = vadd.f32 %v2420_v9, %v185_v12  ;;  %v2554_v15 = vpop.f32.mrb[1].mxu1  ;;  %v124_v16 = vpop.f32.mrb[2].mxu0 }
  0xe6   :  { %v2899_v17 = vmul.f32 0.35355338, %v2896_v11  ;;  %v2901_v18 = vadd.f32 %v2416_v8, %v124_v16  ;;  %v188_v19 = vpop.f32.mrb[2].mxu1  ;;  %v2547_v20 = vpop.f32.mrb[3].mxu0 }
  0xe7   :  { %v2903_v21 = vadd.f32 %v2420_v9, %v188_v19  ;;  %358 = vrot.lane.b32.xlu0 %v186_v14, %s2763_s2  ;;  %v2555_v22 = vpop.f32.mrb[3].mxu1  ;;  %2557 = vmatpush3.xpose.msk.msra.mxu0 %vm194_vm2, %v186_v14 }
  0xe8   :  { %2562 = vmatpush3.msra.mxu1 %v186_v14  ;;  %2566 = vmatprep.subr.mxu0 %v2761_v0 }
  0xe9   :  { %2571 = vmatprep.subr.mxu1 %v2761_v0 }
  0xea   :  { %2559 = vmatmul.mubr.msk.f32.vlgmr.msra.gmra.mrb[4].mxu0 %vm194_vm2, %v2899_v17 }
  0xeb   :  { %356 = vrot.lane.b32.xlu0 %v2899_v17, %s2763_s2  ;;  %2568 = vmatprep.mubr.msk.f32.mxu0 %vm2762_vm0, %v2761_v0 }
 0x159   :  { %v359_v23 = vpop.permute.xlu0 %358 }
 0x15a   :  { %2567 = vmatpush3.xpose.msk.msra.mxu0 %vm194_vm2, %v359_v23 }
 0x15b   :  { %2576 = vmatprep.subr.mxu0 %v2761_v0 }
 0x15d   :  { %v357_v24 = vpop.permute.xlu0 %356 }
 0x15e   :  { %2569 = vmatmul.mubr.msk.f32.vlgmr.msra.gmra.mrb[6].mxu0 %vm194_vm2, %v357_v24  ;;  %v2989_v24 = vmul.f32 0.35355338, %v2901_v18 }
 0x15f   :  { %2578 = vmatprep.mubr.msk.f32.mxu0 %vm2762_vm0, %v2761_v0  ;;  %2577 = vmatpush3.msra.mxu0 %v2935_v44 }
 0x160   :  { %2586 = vmatprep.subr.mxu0 %v2761_v0 }
 0x1bd   :  { %v267_v25 = vpop.f32.mrb[4].mxu0 }
 0x1be   :  { %v2560_v26 = vpop.f32.mrb[5].mxu0  ;;  %v271_v27 = vsel %vm194_vm2, %v267_v25, -inf }
 0x1bf   :  { %272 = vmax.xlane.f32.xlu1 %v271_v27 }
 0x231   :  { %v430_v28 = vpop.f32.mrb[6].mxu0 }
 0x232   :  { %v2570_v29 = vpop.f32.mrb[7].mxu0  ;;  %v434_v30 = vsel %vm194_vm2, %v430_v28, -inf }
 0x233   :  { %435 = vmax.xlane.f32.xlu1 %v434_v30 }
 0x24c   :  { %v273_v31 = vpop.xlane.xlu1 %272 }
 0x24d   :  { %v274_v32 = vsub.f32 %v267_v25, %v273_v31  ;;  %v2996_v25 = vld [vmem:[%s3166_s5 + $0x18] sm:$0xff] }
 0x24f   :  { %v275_v33 = vmul.f32 1.442695, %v274_v32 }
 0x251   :  { %2721 = vpow2.f32 %v275_v33 }
 0x25b   :  { %v2722_v34 = vpop.eup %2721 }
 0x25c   :  { %v277_v35 = vsel %vm194_vm2, %v2722_v34, 0.0 }
 0x25d   :  { %278 = vadd.xlane.f32.xlu0 %v277_v35 }
 0x273   :  { %906 = vrot.lane.b32.xlu0 %v186_v14, %s2764_s4 }
 0x2c0   :  { %v436_v36 = vpop.xlane.xlu1 %435 }
 0x2c1   :  { %v437_v37 = vsub.f32 %v430_v28, %v436_v36 }
 0x2c3   :  { %v438_v38 = vmul.f32 1.442695, %v437_v37 }
 0x2c5   :  { %2723 = vpow2.f32 %v438_v38 }
 0x2cf   :  { %v2724_v39 = vpop.eup %2723 }
 0x2d0   :  { %v440_v40 = vsel %vm194_vm2, %v2724_v39, 0.0 }
 0x2d1   :  { %441 = vadd.xlane.f32.xlu1 %v440_v40 }
 0x2e2   :  { %668 = vrot.lane.b32.xlu1 %v186_v14, %s2765_s26 }
 0x2e6   :  { %666 = vrot.lane.b32.xlu1 %v2899_v17, %s2765_s26 }
 0x2ea   :  { %v279_v41 = vpop.xlane.xlu0 %278 }
 0x2eb   :  { %2725 = vrcp.f32 %v279_v41 }
 0x2ee   :  { %v907_v6 = vpop.permute.xlu0 %906 }
 0x2f5   :  { %v2726_v42 = vpop.eup %2725 }
 0x2f6   :  { %v281_v43 = vmul.f32 %v2726_v42, %v2722_v34 }
 0x2f8   :  { %2564 = vmatmul.mubr.msk.f32.vlgmr.msra.gmra.mrb[4].mxu1 %vm194_vm2, %v281_v43 }
 0x2f9   :  { %2572 = vmatpush3.msra.mxu1 %v359_v23  ;;  %2573 = vmatprep.mubr.msk.f32.mxu1 %vm2762_vm0, %v2761_v0 }
 0x2fa   :  { %2581 = vmatprep.subr.mxu1 %v2761_v0 }
 0x35e   :  { %v442_v45 = vpop.xlane.xlu1 %441 }
 0x35f   :  { %2727 = vrcp.f32 %v442_v45 }
 0x362   :  { %v669_v50 = vpop.permute.xlu1 %668 }
 0x366   :  { %v667_v54 = vpop.permute.xlu1 %666 }
 0x369   :  { %v2728_v46 = vpop.eup %2727 }
 0x36a   :  { %v444_v47 = vmul.f32 %v2728_v46, %v2724_v39 }
 0x36c   :  { %2574 = vmatmul.mubr.msk.f32.vlgmr.msra.gmra.mrb[6].mxu1 %vm194_vm2, %v444_v47 }
 0x36d   :  { %2582 = vmatpush3.msra.mxu1 %v2942_v48  ;;  %2583 = vmatprep.mubr.msk.f32.mxu1 %vm2762_vm0, %v2761_v0 }
 0x36e   :  { %2591 = vmatprep.subr.mxu1 %v2761_v0 }
 0x3cb   :  { %v351_v49 = vpop.f32.mrb[4].mxu1 }
 0x3cc   :  { %v2565_v51 = vpop.f32.mrb[5].mxu1  ;;  %2584 = vmatmul.mubr.msk.f32.vlgmr.msra.gmra.mrb[8].mxu1 %vm194_vm2, %v351_v49 }
 0x3cd   :  { %2592 = vmatpush3.msra.mxu1 %v669_v50  ;;  %2593 = vmatprep.mubr.msk.f32.mxu1 %vm2762_vm0, %v2761_v0 }
 0x3ce   :  { %2601 = vmatprep.subr.mxu1 %v2761_v0 }
 0x43f   :  { %v515_v52 = vpop.f32.mrb[6].mxu1 }
 0x440   :  { %v2575_v53 = vpop.f32.mrb[7].mxu1  ;;  %2579 = vmatmul.mubr.msk.f32.vlgmr.msra.gmra.mrb[8].mxu0 %vm194_vm2, %v515_v52 }
 0x441   :  { %2587 = vmatpush3.xpose.msk.msra.mxu0 %vm194_vm2, %v669_v50  ;;  %2588 = vmatprep.mubr.msk.f32.mxu0 %vm2762_vm0, %v2761_v0 }
 0x442   :  { %2596 = vmatprep.subr.mxu0 %v2761_v0 }
 0x444   :  { %2589 = vmatmul.mubr.msk.f32.vlgmr.msra.gmra.mrb[10].mxu0 %vm194_vm2, %v667_v54 }
 0x445   :  { %2598 = vmatprep.mubr.msk.f32.mxu0 %vm2762_vm0, %v2761_v0  ;;  %2597 = vmatpush3.msra.mxu0 %v2970_v5 }
 0x446   :  { %2606 = vmatprep.subr.mxu0 %v2761_v0 }
 0x49f   :  { %v662_v55 = vpop.f32.mrb[8].mxu1 }
 0x4a0   :  { %v2585_v56 = vpop.f32.mrb[9].mxu1 }
 0x513   :  { %v589_v57 = vpop.f32.mrb[8].mxu0 }
 0x514   :  { %v663_v58 = vadd.f32 %v662_v55, %v589_v57  ;;  %v2580_v59 = vpop.f32.mrb[9].mxu0 }
 0x517   :  { %v740_v60 = vpop.f32.mrb[10].mxu0 }
 0x518   :  { %v2590_v61 = vpop.f32.mrb[11].mxu0  ;;  %v744_v62 = vsel %vm194_vm2, %v740_v60, -inf }
 0x519   :  { %745 = vmax.xlane.f32.xlu1 %v744_v62 }
 0x52a   :  { %1304 = vrot.lane.b32.xlu1 %v2903_v21, %s2763_s2 }
 0x5a6   :  { %v746_v63 = vpop.xlane.xlu1 %745 }
 0x5a7   :  { %v747_v1 = vsub.f32 %v740_v60, %v746_v63 }
 0x5a9   :  { %v748_v2 = vmul.f32 1.442695, %v747_v1 }
 0x5aa   :  { %v1305_v29 = vpop.permute.xlu1 %1304 }
 0x5ab   :  { %2729 = vpow2.f32 %v748_v2 }
 0x5b5   :  { %v2730_v3 = vpop.eup %2729 }
 0x5b6   :  { %v750_v4 = vsel %vm194_vm2, %v2730_v3, 0.0 }
 0x5b7   :  { %751 = vadd.xlane.f32.xlu0 %v750_v4 }
 0x5cd   :  { %904 = vrot.lane.b32.xlu0 %v2899_v17, %s2764_s4 }
 0x644   :  { %v752_v7 = vpop.xlane.xlu0 %751 }
 0x645   :  { %2731 = vrcp.f32 %v752_v7 }
 0x648   :  { %v905_v10 = vpop.permute.xlu0 %904 }
 0x64f   :  { %v2732_v8 = vpop.eup %2731 }
 0x650   :  { %v754_v9 = vmul.f32 %v2732_v8, %v2730_v3 }
 0x652   :  { %2594 = vmatmul.mubr.msk.f32.vlgmr.msra.gmra.mrb[10].mxu1 %vm194_vm2, %v754_v9 }
 0x653   :  { %2602 = vmatpush3.xpose.msk.msra.mxu1 %vm194_vm2, %v907_v6  ;;  %2603 = vmatprep.mubr.msk.f32.mxu1 %vm2762_vm0, %v2761_v0 }
 0x654   :  { %2611 = vmatprep.subr.mxu1 %v2761_v0 }
 0x656   :  { %2604 = vmatmul.mubr.msk.f32.vlgmr.msra.gmra.mrb[12].mxu1 %vm194_vm2, %v905_v10 }
 0x657   :  { %2613 = vmatprep.mubr.msk.f32.mxu1 %vm2762_vm0, %v2761_v0  ;;  %2612 = vmatpush3.msra.mxu1 %v2996_v25 }
 0x658   :  { %2621 = vmatprep.subr.mxu1 %v2761_v0 }
 0x725   :  { %v825_v12 = vpop.f32.mrb[10].mxu1 }
 0x726   :  { %v2595_v13 = vpop.f32.mrb[11].mxu1  ;;  %2599 = vmatmul.mubr.msk.f32.vlgmr.msra.gmra.mrb[12].mxu0 %vm194_vm2, %v825_v12 }
 0x727   :  { %2607 = vmatpush3.msra.mxu0 %v907_v6  ;;  %2608 = vmatprep.mubr.msk.f32.mxu0 %vm2762_vm0, %v2761_v0 }
 0x728   :  { %2616 = vmatprep.subr.mxu0 %v2761_v0 }
 0x729   :  { %v978_v14 = vpop.f32.mrb[12].mxu1 }
 0x72a   :  { %v2605_v15 = vpop.f32.mrb[13].mxu1  ;;  %v982_v16 = vsel %vm194_vm2, %v978_v14, -inf }
 0x72b   :  { %983 = vmax.xlane.f32.xlu0 %v982_v16 }
 0x7b8   :  { %v984_v17 = vpop.xlane.xlu0 %983 }
 0x7b9   :  { %v985_v19 = vsub.f32 %v978_v14, %v984_v17 }
 0x7bb   :  { %v986_v20 = vmul.f32 1.442695, %v985_v19 }
 0x7bd   :  { %2733 = vpow2.f32 %v986_v20 }
 0x7c7   :  { %v2734_v22 = vpop.eup %2733 }
 0x7c8   :  { %v988_v23 = vsel %vm194_vm2, %v2734_v22, 0.0 }
 0x7c9   :  { %989 = vadd.xlane.f32.xlu1 %v988_v23 }
 0x7da   :  { %1302 = vrot.lane.b32.xlu1 %v2989_v24, %s2763_s2 }
 0x7f9   :  { %v899_v26 = vpop.f32.mrb[12].mxu0 }
 0x7fa   :  { %v903_v27 = vadd.f32 %v899_v26, %v663_v58  ;;  %v2600_v28 = vpop.f32.mrb[13].mxu0 }
 0x856   :  { %v990_v30 = vpop.xlane.xlu1 %989 }
 0x857   :  { %2735 = vrcp.f32 %v990_v30 }
 0x85a   :  { %v1303_v33 = vpop.permute.xlu1 %1302 }
 0x861   :  { %v2736_v31 = vpop.eup %2735 }
 0x862   :  { %v992_v32 = vmul.f32 %v2736_v31, %v2734_v22 }
 0x864   :  { %2609 = vmatmul.mubr.msk.f32.vlgmr.msra.gmra.mrb[14].mxu0 %vm194_vm2, %v992_v32 }
 0x865   :  { %2617 = vmatpush3.xpose.msk.msra.mxu0 %vm194_vm2, %v2903_v21  ;;  %2618 = vmatprep.mubr.msk.f32.mxu0 %vm2762_vm0, %v2761_v0 }
 0x866   :  { %2626 = vmatprep.subr.mxu0 %v2761_v0 }
 0x868   :  { %2619 = vmatmul.mubr.msk.f32.vlgmr.msra.gmra.mrb[16].mxu0 %vm194_vm2, %v2989_v24 }
 0x869   :  { %2627 = vmatpush3.xpose.msk.msra.mxu0 %vm194_vm2, %v1305_v29  ;;  %2628 = vmatprep.mubr.msk.f32.mxu0 %vm2762_vm0, %v2761_v0 }
 0x86a   :  { %2636 = vmatprep.subr.mxu0 %v2761_v0 }
 0x86c   :  { %2629 = vmatmul.mubr.msk.f32.vlgmr.msra.gmra.mrb[18].mxu0 %vm194_vm2, %v1303_v33 }
 0x86d   :  { %2637 = vmatpush3.msra.mxu0 %v2935_v44  ;;  %2638 = vmatprep.mubr.msk.f32.mxu0 %vm2762_vm0, %v2761_v0 }
 0x86e   :  { %2646 = vmatprep.subr.mxu0 %v2761_v0 }
 0x937   :  { %v1063_v34 = vpop.f32.mrb[14].mxu0 }
 0x938   :  { %v2610_v35 = vpop.f32.mrb[15].mxu0  ;;  %2614 = vmatmul.mubr.msk.f32.vlgmr.msra.gmra.mrb[14].mxu1 %vm194_vm2, %v1063_v34 }
 0x939   :  { %2622 = vmatpush3.msra.mxu1 %v2903_v21  ;;  %2623 = vmatprep.mubr.msk.f32.mxu1 %vm2762_vm0, %v2761_v0 }
 0x93a   :  { %2631 = vmatprep.subr.mxu1 %v2761_v0 }
 0x93b   :  { %v1214_v36 = vpop.f32.mrb[16].mxu0 }
 0x93c   :  { %v2620_v37 = vpop.f32.mrb[17].mxu0  ;;  %v1218_v38 = vsel %vm194_vm2, %v1214_v36, -inf }
 0x93d   :  { %1219 = vmax.xlane.f32.xlu1 %v1218_v38 }
 0x93f   :  { %v1376_v39 = vpop.f32.mrb[18].mxu0 }
 0x940   :  { %v2630_v40 = vpop.f32.mrb[19].mxu0  ;;  %v1380_v41 = vsel %vm194_vm2, %v1376_v39, -inf }
 0x941   :  { %1381 = vmax.xlane.f32.xlu0 %v1380_v41 }
 0x94e   :  { %1611 = vrot.lane.b32.xlu1 %v2989_v24, %s2765_s26 }
 0x9ca   :  { %v1220_v42 = vpop.xlane.xlu1 %1219 }
 0x9cb   :  { %v1221_v43 = vsub.f32 %v1214_v36, %v1220_v42 }
 0x9cd   :  { %v1222_v44 = vmul.f32 1.442695, %v1221_v43 }
 0x9ce   :  { %v1382_v45 = vpop.xlane.xlu0 %1381 }
 0x9cf   :  { %2737 = vpow2.f32 %v1222_v44  ;;  %v1383_v46 = vsub.f32 %v1376_v39, %v1382_v45 }
 0x9d1   :  { %v1384_v47 = vmul.f32 1.442695, %v1383_v46 }
 0x9d3   :  { %2739 = vpow2.f32 %v1384_v47 }
 0x9d9   :  { %v2738_v49 = vpop.eup %2737 }
 0x9da   :  { %v1224_v50 = vsel %vm194_vm2, %v2738_v49, 0.0 }
 0x9db   :  { %1225 = vadd.xlane.f32.xlu0 %v1224_v50 }
 0x9dd   :  { %v2740_v51 = vpop.eup %2739 }
 0x9de   :  { %v1386_v52 = vsel %vm194_vm2, %v2740_v51, 0.0 }
 0x9df   :  { %1387 = vadd.xlane.f32.xlu0 %v1386_v52 }
 0x9f5   :  { %1613 = vrot.lane.b32.xlu0 %v2903_v21, %s2765_s26 }
 0xa0b   :  { %v1137_v53 = vpop.f32.mrb[14].mxu1 }
 0xa0c   :  { %v3030_v54 = vadd.f32 %v1137_v53, %v903_v27  ;;  %v2615_v55 = vpop.f32.mrb[15].mxu1 }
 0xa68   :  { %v1226_v56 = vpop.xlane.xlu0 %1225 }
 0xa69   :  { %2741 = vrcp.f32 %v1226_v56 }
 0xa6c   :  { %v1388_v57 = vpop.xlane.xlu0 %1387 }
 0xa6d   :  { %2743 = vrcp.f32 %v1388_v57 }
 0xa70   :  { %v1614_v63 = vpop.permute.xlu0 %1613 }
 0xa73   :  { %v2742_v58 = vpop.eup %2741 }
 0xa74   :  { %v1228_v59 = vmul.f32 %v2742_v58, %v2738_v49 }
 0xa76   :  { %2624 = vmatmul.mubr.msk.f32.vlgmr.msra.gmra.mrb[16].mxu1 %vm194_vm2, %v1228_v59 }
 0xa77   :  { %v2744_v60 = vpop.eup %2743  ;;  %2632 = vmatpush3.msra.mxu1 %v1305_v29  ;;  %2633 = vmatprep.mubr.msk.f32.mxu1 %vm2762_vm0, %v2761_v0 }
 0xa78   :  { %v1390_v61 = vmul.f32 %v2744_v60, %v2740_v51  ;;  %2641 = vmatprep.subr.mxu1 %v2761_v0 }
 0xa7a   :  { %2634 = vmatmul.mubr.msk.f32.vlgmr.msra.gmra.mrb[18].mxu1 %vm194_vm2, %v1390_v61 }
 0xa7b   :  { %2642 = vmatpush3.msra.mxu1 %v2942_v48  ;;  %2643 = vmatprep.mubr.msk.f32.mxu1 %vm2762_vm0, %v2761_v0  ;;  %v1612_v48 = vpop.permute.xlu1 %1611 }
 0xa7c   :  { %2651 = vmatprep.subr.mxu1 %v2761_v0 }
 0xb49   :  { %v1298_v62 = vpop.f32.mrb[16].mxu1 }
 0xb4a   :  { %v2625_v1 = vpop.f32.mrb[17].mxu1  ;;  %2644 = vmatmul.mubr.msk.f32.vlgmr.msra.gmra.mrb[20].mxu1 %vm194_vm2, %v1298_v62  ;;  %v2713_v62 = vld [vmem:[%s3168_s9] sm:$0xff]  }
 0xb4b   :  { %2652 = vmatpush3.msra.mxu1 %v1614_v63  ;;  %2653 = vmatprep.mubr.msk.f32.mxu1 %vm2762_vm0, %v2761_v0  ;;  %v2716_v1 = vld [vmem:[%s3169_s11 + $0x8] sm:$0xff]  }
 0xb4c   :  { %2661 = vmatprep.subr.mxu1 %v2761_v0 }
 0xb4d   :  { %v1461_v2 = vpop.f32.mrb[18].mxu1 }
 0xb4e   :  { %v2635_v3 = vpop.f32.mrb[19].mxu1  ;;  %2639 = vmatmul.mubr.msk.f32.vlgmr.msra.gmra.mrb[20].mxu0 %vm194_vm2, %v1461_v2 }
 0xb4f   :  { %2647 = vmatpush3.xpose.msk.msra.mxu0 %vm194_vm2, %v1614_v63  ;;  %2648 = vmatprep.mubr.msk.f32.mxu0 %vm2762_vm0, %v2761_v0  ;;  %v2715_v63 = vld [vmem:[%s3169_s11] sm:$0xff]  }
 0xb50   :  { %2656 = vmatprep.subr.mxu0 %v2761_v0 }
 0xb52   :  { %2649 = vmatmul.mubr.msk.f32.vlgmr.msra.gmra.mrb[22].mxu0 %vm194_vm2, %v1612_v48 }
 0xb53   :  { %2657 = vmatpush3.msra.mxu0 %v2970_v5  ;;  %2658 = vmatprep.mubr.msk.f32.mxu0 %vm2762_vm0, %v2761_v0 }
 0xb54   :  { %2666 = vmatprep.subr.mxu0 %v2761_v0 }
 0xc1d   :  { %v1607_v4 = vpop.f32.mrb[20].mxu1 }
 0xc1e   :  { %v2645_v6 = vpop.f32.mrb[21].mxu1 }
 0xc21   :  { %v1534_v7 = vpop.f32.mrb[20].mxu0 }
 0xc22   :  { %v1608_v8 = vadd.f32 %v1607_v4, %v1534_v7  ;;  %v2640_v9 = vpop.f32.mrb[21].mxu0 }
 0xc25   :  { %v1685_v10 = vpop.f32.mrb[22].mxu0 }
 0xc26   :  { %v2650_v12 = vpop.f32.mrb[23].mxu0  ;;  %v1689_v13 = vsel %vm194_vm2, %v1685_v10, -inf }
 0xc27   :  { %1690 = vmax.xlane.f32.xlu0 %v1689_v13 }
 0xc3d   :  { %1850 = vrot.lane.b32.xlu0 %v2903_v21, %s2764_s4 }
 0xcb4   :  { %v1691_v14 = vpop.xlane.xlu0 %1690 }
 0xcb5   :  { %v1692_v5 = vsub.f32 %v1685_v10, %v1691_v14  ;;  %v2457_v10 = vld [vmem:[%s3170_s7] ss:$0 sm:$0xff] }
 0xcb7   :  { %v1693_v15 = vmul.f32 1.442695, %v1692_v5  ;;  %v2458_v5 = vld [vmem:[%s3171_s8] ss:$0 sm:$0xff] }
 0xcb8   :  { %v1851_v23 = vpop.permute.xlu0 %1850 }
 0xcb9   :  { %2745 = vpow2.f32 %v1693_v15 }
 0xcc3   :  { %v2746_v16 = vpop.eup %2745 }
 0xcc4   :  { %v1695_v17 = vsel %vm194_vm2, %v2746_v16, 0.0 }
 0xcc5   :  { %1696 = vadd.xlane.f32.xlu1 %v1695_v17 }
 0xcd6   :  { %1848 = vrot.lane.b32.xlu1 %v2989_v24, %s2764_s4  ;;  %v2456_v24 = vld [vmem:[%s3167_s6] ss:$0 sm:$0xff] }
 0xcd7   :  { %v2092_v27 = vadd.f32 %v2456_v24, %v3030_v54 }
 0xcd9   :  { %v2094_v31 = vadd.f32 %v2092_v27, %v2896_v11 }
 0xcdb   :  { %v2098_v32 = vsel %vm83_vm1, %v2094_v31, 0.0 }
 0xd52   :  { %v1697_v19 = vpop.xlane.xlu1 %1696 }
 0xd53   :  { %2747 = vrcp.f32 %v1697_v19 }
 0xd56   :  { %v1849_v21 = vpop.permute.xlu1 %1848 }
 0xd5d   :  { %v2748_v20 = vpop.eup %2747 }
 0xd5e   :  { %v1699_v22 = vmul.f32 %v2748_v20, %v2746_v16  ;;  %v2717_v20 = vld [vmem:[%s3169_s11 + $0x10] sm:$0xff]  }
 0xd60   :  { %2654 = vmatmul.mubr.msk.f32.vlgmr.msra.gmra.mrb[22].mxu1 %vm194_vm2, %v1699_v22  ;;  %v2718_v22 = vld [vmem:[%s3169_s11 + $0x18] sm:$0xff]  }
 0xd61   :  { %2662 = vmatpush3.xpose.msk.msra.mxu1 %vm194_vm2, %v1851_v23  ;;  %2663 = vmatprep.mubr.msk.f32.mxu1 %vm2762_vm0, %v2761_v0 }
 0xd62   :  { %2671 = vmatprep.subr.mxu1 %v2761_v0 }
 0xd64   :  { %2664 = vmatmul.mubr.msk.f32.vlgmr.msra.gmra.mrb[24].mxu1 %vm194_vm2, %v1849_v21 }
 0xd65   :  { %2672 = vmatpush3.msra.mxu1 %v2996_v25  ;;  %2673 = vmatprep.mubr.msk.f32.mxu1 %vm2762_vm0, %v2761_v0 }
 0xd66   :  { %2684 = vmatprep.subr.bf16.mxu1 %v2761_v0 }
 0xe33   :  { %v1770_v26 = vpop.f32.mrb[22].mxu1 }
 0xe34   :  { %v2655_v28 = vpop.f32.mrb[23].mxu1  ;;  %2659 = vmatmul.mubr.msk.f32.vlgmr.msra.gmra.mrb[24].mxu0 %vm194_vm2, %v1770_v26 }
 0xe35   :  { %2667 = vmatpush3.msra.mxu0 %v1851_v23  ;;  %2668 = vmatprep.mubr.msk.f32.mxu0 %vm2762_vm0, %v2761_v0  ;;  %v2459_v23 = vld [vmem:[%s3172_s10] ss:$0 sm:$0xff] }
 0xe36   :  { %2676 = vmatprep.subr.bf16.mxu0 %v2761_v0 }
 0xe37   :  { %v1922_v25 = vpop.f32.mrb[24].mxu1 }
 0xe38   :  { %v2665_v29 = vpop.f32.mrb[25].mxu1  ;;  %v1926_v30 = vsel %vm194_vm2, %v1922_v25, -inf }
 0xe39   :  { %1927 = vmax.xlane.f32.xlu0 %v1926_v30 }
 0xe3d   :  { %2099 = vadd.xlane.f32.xlu0 %v2098_v32  ;;  %v2463_v32 = vld [vmem:[%s3173_s12] ss:$0 sm:$0xff] }
 0xec6   :  { %v1928_v33 = vpop.xlane.xlu0 %1927 }
 0xec7   :  { %v1929_v34 = vsub.f32 %v1922_v25, %v1928_v33 }
 0xec9   :  { %v1930_v35 = vmul.f32 1.442695, %v1929_v34 }
 0xeca   :  { %v2100_v45 = vpop.xlane.xlu0 %2099 }
 0xecb   :  { %2749 = vpow2.f32 %v1930_v35  ;;  %v2105_v46 = vmul.f32 0.03125, %v2100_v45 }
 0xecd   :  { %v2107_v51 = vsub.f32 %v2094_v31, %v2105_v46 }
 0xecf   :  { %v2109_v55 = vmul.f32 %v2107_v51, %v2107_v51 }
 0xed1   :  { %v2111_v56 = vsel %vm83_vm1, %v2109_v55, 0.0 }
 0xed5   :  { %v2750_v36 = vpop.eup %2749 }
 0xed6   :  { %v1932_v37 = vsel %vm194_vm2, %v2750_v36, 0.0 }
 0xed7   :  { %1933 = vadd.xlane.f32.xlu1 %v1932_v37 }
 0xf07   :  { %v1843_v38 = vpop.f32.mrb[24].mxu0 }
 0xf08   :  { %v1847_v39 = vadd.f32 %v1843_v38, %v1608_v8  ;;  %v2660_v40 = vpop.f32.mrb[25].mxu0 }
 0xf64   :  { %v1934_v41 = vpop.xlane.xlu1 %1933 }
 0xf65   :  { %2751 = vrcp.f32 %v1934_v41 }
 0xf6f   :  { %v2752_v42 = vpop.eup %2751 }
 0xf70   :  { %v1936_v43 = vmul.f32 %v2752_v42, %v2750_v36 }
 0xf72   :  { %2669 = vmatmul.mubr.msk.f32.vlgmr.msra.gmra.mrb[26].mxu0 %vm194_vm2, %v1936_v43 }
 0xf73   :  { %2680 = vmatprep.mubr.msk.bf16.mxu0 %vm2762_vm0, %v2761_v0  ;;  %2677 = vmatpush3.bf16.msra.mxu0 %v2713_v62  ;;  %v2469_v62 = vld [vmem:[%s3175_s13] ss:$0 sm:$0xff] }
 0xf74   :  { %2678 = vmatprep.subr.bf16.mxu0 %v2761_v0 }
0x1045   :  { %v2007_v11 = vpop.f32.mrb[26].mxu0 }
0x1046   :  { %v2670_v44 = vpop.f32.mrb[27].mxu0  ;;  %2674 = vmatmul.mubr.msk.f32.vlgmr.msra.gmra.mrb[26].mxu1 %vm194_vm2, %v2007_v11 }
0x1047   :  { %2692 = vmatprep.mubr.msk.bf16.mxu1 %vm2762_vm0, %v2761_v0  ;;  %2685 = vmatpush3.bf16.msra.mxu1 %v2715_v63 }
0x1048   :  { %2686 = vmatprep.subr.bf16.mxu1 %v2761_v0 }
0x104b   :  { %2687 = vmatpush3.bf16.msra.mxu1 %v2716_v1 }
0x104c   :  { %2688 = vmatprep.subr.bf16.mxu1 %v2761_v0 }
0x104f   :  { %2689 = vmatpush3.bf16.msra.mxu1 %v2717_v20 }
0x1050   :  { %2690 = vmatprep.subr.bf16.mxu1 %v2761_v0 }
0x1053   :  { %2691 = vmatpush3.bf16.msra.mxu1 %v2718_v22 }
0x1119   :  { %v2080_v47 = vpop.f32.mrb[26].mxu1 }
0x111a   :  { %v2084_v49 = vadd.f32 %v2080_v47, %v1847_v39  ;;  %v2675_v50 = vpop.f32.mrb[27].mxu1 }
0x111c   :  { %v2093_v52 = vadd.f32 %v2456_v24, %v2084_v49 }
0x111e   :  { %v2095_v53 = vadd.f32 %v2093_v52, %v2901_v18  ;;  %v2714_v18 = vld [vmem:[%s3168_s9 + $0x8] sm:$0xff]  }
0x111f   :  { %2679 = vmatpush3.bf16.msra.mxu0 %v2714_v18 }
0x1120   :  { %v2101_v54 = vsel %vm83_vm1, %v2095_v53, 0.0  ;;  %2696 = vmatprep.subr.bf16.mxu0 %v2761_v0 }
0x1121   :  { %2102 = vadd.xlane.f32.xlu0 %v2101_v54  ;;  %v2720_v54 = vld [vmem:[%s3174_s15 + $0x8] sm:$0xff]  }
0x1125   :  { %2112 = vadd.xlane.f32.xlu0 %v2111_v56 }
0x11ae   :  { %v2103_v57 = vpop.xlane.xlu0 %2102 }
0x11af   :  { %v2106_v58 = vmul.f32 0.03125, %v2103_v57 }
0x11b1   :  { %v2108_v59 = vsub.f32 %v2095_v53, %v2106_v58  ;;  %v2719_v53 = vld [vmem:[%s3174_s15] sm:$0xff]  }
0x11b2   :  { %v2113_v2 = vpop.xlane.xlu0 %2112 }
0x11b3   :  { %v2110_v60 = vmul.f32 %v2108_v59, %v2108_v59  ;;  %v2117_v3 = vmul.f32 0.03125, %v2113_v2 }
0x11b5   :  { %v2114_v61 = vsel %vm83_vm1, %v2110_v60, 0.0  ;;  %v2119_v48 = vadd.f32 1e-05, %v2117_v3 }
0x11b6   :  { %2115 = vadd.xlane.f32.xlu0 %v2114_v61 }
0x11b7   :  { %2753 = vrsqrt.f32 %v2119_v48 }
0x11c1   :  { %v2754_v8 = vpop.eup %2753 }
0x11c2   :  { %v2123_v9 = vmul.f32 %v2754_v8, %v2107_v51 }
0x11c4   :  { %v2131_v13 = vmul.f32 %v2457_v10, %v2123_v9 }
0x11c6   :  { %v2139_v16 = vadd.f32 %v2458_v5, %v2131_v13 }
0x1243   :  { %v2116_v4 = vpop.xlane.xlu0 %2115 }
0x1244   :  { %v2118_v6 = vmul.f32 0.03125, %v2116_v4 }
0x1246   :  { %v2120_v7 = vadd.f32 1e-05, %v2118_v6 }
0x1248   :  { %2755 = vrsqrt.f32 %v2120_v7  ;;  %v2471_v7 = vld [vmem:[%s3177_s16] ss:$0 sm:$0xff] }
0x1252   :  { %v2756_v12 = vpop.eup %2755 }
0x1253   :  { %v2124_v14 = vmul.f32 %v2756_v12, %v2108_v59 }
0x1255   :  { %v2132_v15 = vmul.f32 %v2457_v10, %v2124_v14 }
0x1257   :  { %v2140_v17 = vadd.f32 %v2458_v5, %v2132_v15 }
0x1259   :  { %v2141_v19 = vpack.c.bf16 %v2140_v17, %v2139_v16 }
0x125b   :  { %2681 = vmatmul.mubr.msk.bf16.vlgmr.msra.gmra.mrb[28].mxu0 %vm83_vm1, %v2141_v19 }
0x125c   :  { %2700 = vmatprep.mubr.msk.bf16.mxu0 %vm2762_vm0, %v2761_v0  ;;  %2697 = vmatpush3.bf16.msra.mxu0 %v2719_v53 }
0x125d   :  { %2698 = vmatprep.subr.bf16.mxu0 %v2761_v0  ;;  %v2470_v0 = vld [vmem:[%s3176_s14] ss:$0 sm:$0xff] }
0x1260   :  { %2699 = vmatpush3.bf16.msra.mxu0 %v2720_v54 }
0x132e   :  { %v2202_v21 = vpop.f32.mrb[28].mxu0 }
0x132f   :  { %v2203_v24 = vadd.f32 %v2459_v23, %v2202_v21  ;;  %v2682_v26 = vpop.f32.mrb[29].mxu0 }
0x1330   :  { %v2205_v27 = vpop.f32.mrb[30].mxu0 }
0x1331   :  { %v2206_v28 = vadd.f32 %v2459_v23, %v2205_v27  ;;  %v2683_v25 = vpop.f32.mrb[31].mxu0  ;;  %v2209_v29 = vmax.f32 %v2203_v24, 0.0 }
0x1333   :  { %v2210_v30 = vmax.f32 %v2206_v28, 0.0 }
0x1335   :  { %v2211_v31 = vpack.c.bf16 %v2210_v30, %v2209_v29 }
0x1337   :  { %2693 = vmatmul.mubr.msk.bf16.vlgmr.msra.gmra.mrb[28].mxu1 %vm2251_vm3, %v2211_v31 }
0x140a   :  { %v2289_v33 = vpop.f32.mrb[28].mxu1 }
0x140b   :  { %v2290_v34 = vadd.f32 %v2463_v32, %v2289_v33  ;;  %v2694_v35 = vpop.f32.mrb[29].mxu1 }
0x140c   :  { %v2292_v36 = vpop.f32.mrb[30].mxu1 }
0x140d   :  { %v2293_v37 = vadd.f32 %v2463_v32, %v2292_v36  ;;  %v2695_v38 = vpop.f32.mrb[31].mxu1  ;;  %v2296_v39 = vadd.f32 %v2290_v34, %v2139_v16 }
0x140f   :  { %v2300_v40 = vsel %vm83_vm1, %v2296_v39, 0.0  ;;  %v2297_v41 = vadd.f32 %v2293_v37, %v2140_v17 }
0x1410   :  { %2301 = vadd.xlane.f32.xlu0 %v2300_v40 }
0x1411   :  { %v2303_v42 = vsel %vm83_vm1, %v2297_v41, 0.0 }
0x1412   :  { %2304 = vadd.xlane.f32.xlu1 %v2303_v42 }
0x149d   :  { %v2302_v43 = vpop.xlane.xlu0 %2301 }
0x149e   :  { %v2306_v11 = vmul.f32 0.03125, %v2302_v43 }
0x149f   :  { %v2305_v44 = vpop.xlane.xlu1 %2304 }
0x14a0   :  { %v2308_v45 = vsub.f32 %v2296_v39, %v2306_v11  ;;  %v2307_v46 = vmul.f32 0.03125, %v2305_v44 }
0x14a2   :  { %v2309_v47 = vsub.f32 %v2297_v41, %v2307_v46  ;;  %v2310_v49 = vmul.f32 %v2308_v45, %v2308_v45 }
0x14a4   :  { %v2312_v50 = vsel %vm83_vm1, %v2310_v49, 0.0  ;;  %v2311_v51 = vmul.f32 %v2309_v47, %v2309_v47 }
0x14a5   :  { %2313 = vadd.xlane.f32.xlu0 %v2312_v50 }
0x14a6   :  { %v2315_v52 = vsel %vm83_vm1, %v2311_v51, 0.0 }
0x14a7   :  { %2316 = vadd.xlane.f32.xlu1 %v2315_v52 }
0x1532   :  { %v2314_v55 = vpop.xlane.xlu0 %2313 }
0x1533   :  { %v2318_v56 = vmul.f32 0.03125, %v2314_v55 }
0x1534   :  { %v2317_v57 = vpop.xlane.xlu1 %2316 }
0x1535   :  { %v2320_v58 = vadd.f32 1e-05, %v2318_v56  ;;  %v2319_v59 = vmul.f32 0.03125, %v2317_v57 }
0x1537   :  { %2757 = vrsqrt.f32 %v2320_v58  ;;  %v2321_v60 = vadd.f32 1e-05, %v2319_v59 }
0x1539   :  { %2759 = vrsqrt.f32 %v2321_v60 }
0x1541   :  { %v2758_v61 = vpop.eup %2757 }
0x1542   :  { %v2324_v18 = vmul.f32 %v2758_v61, %v2308_v45 }
0x1543   :  { %v2760_v63 = vpop.eup %2759 }
0x1544   :  { %v2332_v1 = vmul.f32 %v2469_v62, %v2324_v18  ;;  %v2325_v2 = vmul.f32 %v2760_v63, %v2309_v47 }
0x1546   :  { %v2333_v3 = vmul.f32 %v2469_v62, %v2325_v2  ;;  %v2340_v48 = vadd.f32 %v2470_v0, %v2332_v1 }
0x1548   :  { %v2341_v4 = vadd.f32 %v2470_v0, %v2333_v3 }
0x154a   :  { %v2342_v6 = vpack.c.bf16 %v2341_v4, %v2340_v48 }
0x154c   :  { %2701 = vmatmul.mubr.msk.bf16.vlgmr.msra.gmra.mrb[32].mxu0 %vm83_vm1, %v2342_v6 }
0x161f   :  { %v2403_v8 = vpop.f32.mrb[32].mxu0 }
0x1620   :  { %v2404_v9 = vadd.f32 %v2471_v7, %v2403_v8  ;;  %v2702_v10 = vpop.f32.mrb[33].mxu0 }
0x1621   :  { %v2406_v12 = vpop.f32.mrb[34].mxu0 }
0x1622   :  { %2410 = vst.msk [vmem:[%s3178_s17] sm:$0xff] %vm2251_vm3, %v2404_v9  ;;  %v2407_v13 = vadd.f32 %v2471_v7, %v2406_v12  ;;  %v2703_v14 = vpop.f32.mrb[35].mxu0 }
0x1624   :  { %2411 = vst.msk [vmem:[%s3178_s17 + $0x8] sm:$0xff] %vm2251_vm3, %v2407_v13 }

</bundles_post_ra>
